<compile_context>
chip_gen: v7x
topology: tpu7x:2x2x1
jax: 0.10.0
libtpu: 0.0.40
codegen_flags: <defaults>
</compile_context>

<pallas_src>
import functools

import numpy as np
import jax
import jax.numpy as jnp
from jax import lax
from jax.experimental import pallas as pl
from jax.experimental.pallas import tpu as pltpu


def _round_up(x, m):
    return (x + m - 1) // m * m


def _reorder_gates(a):
    """PyTorch LSTM gate order (i, f, g, o) -> (i, f, o, g) along last dim."""
    i, f, g, o = jnp.split(a, 4, axis=-1)
    return jnp.concatenate([i, f, o, g], axis=-1)


def _prep_dir_params(p):
    """PyTorch-layout params -> (W_ih^T, W_hh^T, bias) with reordered gates."""
    w_ih_t = _reorder_gates(jnp.transpose(p["w_ih"]))             # (in, 4H)
    w_hh_t = _reorder_gates(jnp.transpose(p["w_hh"]))             # (H, 4H)
    bias = _reorder_gates(p["b_ih"] + p["b_hh"]).reshape(1, -1)   # (1, 4H)
    return w_ih_t, w_hh_t, bias


# ---------------------------------------------------------------------------
# Fused per-layer kernel: chunked input projection + interleaved fwd/bwd
# LSTM recurrence.  x/out refs are 2-D (rows = time*batch, feature) so all
# per-step accesses are aligned dynamic sublane slices (no in-kernel reshape).
# ---------------------------------------------------------------------------
def _bilstm_layer_kernel(xf_ref, xb_ref, wif_ref, wib_ref, whf_ref, whb_ref,
                         bf_ref, bb_ref, h0f_ref, c0f_ref, h0b_ref, c0b_ref,
                         outf_ref, outb_ref, hnf_ref, cnf_ref, hnb_ref, cnb_ref,
                         hf_sc, cf_sc, hb_sc, cb_sc, xpf_sc, xpb_sc,
                         *, hidden_size, chunk, batch, seq_len, mask_tail):
    tc = pl.program_id(0)
    n_chunks = pl.num_programs(0)
    H, C, B = hidden_size, chunk, batch

    @pl.when(tc == 0)
    def _():
        hf_sc[...] = h0f_ref[...]
        cf_sc[...] = c0f_ref[...]
        hb_sc[...] = h0b_ref[...]
        cb_sc[...] = c0b_ref[...]

    # Whole-chunk input projection: one (C*B, in) x (in, 4H) MXU GEMM per
    # direction -- the x-part of the gates has no time dependence.
    xpf_sc[...] = (jnp.dot(xf_ref[...], wif_ref[...],
                           preferred_element_type=jnp.float32) + bf_ref[...])
    xpb_sc[...] = (jnp.dot(xb_ref[...], wib_ref[...],
                           preferred_element_type=jnp.float32) + bb_ref[...])

    whf = whf_ref[...]
    whb = whb_ref[...]

    def cell(gates, c_prev):
        # gate layout (i, f, o | g): one sigmoid over a 3H slab, one tanh on H
        act = jax.nn.sigmoid(gates[:, :3 * H])
        i_g = act[:, 0:H]
        f_g = act[:, H:2 * H]
        o_g = act[:, 2 * H:]
        g_g = jnp.tanh(gates[:, 3 * H:])
        c_new = f_g * c_prev + i_g * g_g
        h_new = o_g * jnp.tanh(c_new)
        return h_new, c_new

    def step(s, carry):
        hf, cf, hb, cb = carry
        sb = C - 1 - s                      # backward local time within chunk
        rf = pl.multiple_of(s * B, B)
        rb = pl.multiple_of(sb * B, B)
        # Two independent chains -> the scheduler can overlap their latency.
        gates_f = xpf_sc[pl.ds(rf, B), :] + jnp.dot(
            hf, whf, preferred_element_type=jnp.float32)
        gates_b = xpb_sc[pl.ds(rb, B), :] + jnp.dot(
            hb, whb, preferred_element_type=jnp.float32)
        hf_n, cf_n = cell(gates_f, cf)
        hb_n, cb_n = cell(gates_b, cb)
        if mask_tail:
            vf = tc * C + s < seq_len
            vb = (n_chunks - 1 - tc) * C + sb < seq_len
            hf_n = jnp.where(vf, hf_n, hf)
            cf_n = jnp.where(vf, cf_n, cf)
            hb_n = jnp.where(vb, hb_n, hb)
            cb_n = jnp.where(vb, cb_n, cb)
        outf_ref[pl.ds(rf, B), :] = hf_n
        outb_ref[pl.ds(rb, B), :] = hb_n
        return hf_n, cf_n, hb_n, cb_n

    hf, cf, hb, cb = lax.fori_loop(
        0, C, step, (hf_sc[...], cf_sc[...], hb_sc[...], cb_sc[...]),
        unroll=True)

    hf_sc[...] = hf
    cf_sc[...] = cf
    hb_sc[...] = hb
    cb_sc[...] = cb

    @pl.when(tc == n_chunks - 1)                 # gated final-state stores
    def _():
        hnf_ref[...] = hf
        cnf_ref[...] = cf
        hnb_ref[...] = hb
        cnb_ref[...] = cb


def _bilstm_layer(x2d, wih_f, wih_b, whh_f, whh_b, b_f, b_b,
                  h0f, c0f, h0b, c0b, *, hidden_size, batch, chunk, n_chunks,
                  seq_len):
    rows, in_dim = x2d.shape
    H, B, C = hidden_size, batch, chunk
    four_h = 4 * H
    rows_blk = C * B
    mask_tail = (n_chunks * C != seq_len)

    kernel = functools.partial(
        _bilstm_layer_kernel, hidden_size=H, chunk=C, batch=B,
        seq_len=seq_len, mask_tail=mask_tail)

    row_f = lambda tc: (tc, 0)
    row_b = lambda tc: (n_chunks - 1 - tc, 0)
    const = lambda tc: (0, 0)
    bh_spec = pl.BlockSpec((B, H), const)

    cost = pl.CostEstimate(
        flops=2 * 2 * rows * four_h * (in_dim + H),
        transcendentals=2 * rows * 5 * H,
        bytes_accessed=4 * (2 * rows * in_dim + 2 * rows * H
                            + 2 * four_h * (in_dim + H + 1) + 8 * B * H),
    )

    return pl.pallas_call(
        kernel,
        out_shape=(jax.ShapeDtypeStruct((rows, H), jnp.float32),
                   jax.ShapeDtypeStruct((rows, H), jnp.float32),
                   jax.ShapeDtypeStruct((B, H), jnp.float32),
                   jax.ShapeDtypeStruct((B, H), jnp.float32),
                   jax.ShapeDtypeStruct((B, H), jnp.float32),
                   jax.ShapeDtypeStruct((B, H), jnp.float32)),
        grid=(n_chunks,),
        in_specs=[
            pl.BlockSpec((rows_blk, in_dim), row_f),   # x block for fwd chain
            pl.BlockSpec((rows_blk, in_dim), row_b),   # x block for bwd chain
            pl.BlockSpec((in_dim, four_h), const),     # W_ih^T fwd (resident)
            pl.BlockSpec((in_dim, four_h), const),     # W_ih^T bwd
            pl.BlockSpec((H, four_h), const),          # W_hh^T fwd
            pl.BlockSpec((H, four_h), const),          # W_hh^T bwd
            pl.BlockSpec((1, four_h), const),          # bias fwd
            pl.BlockSpec((1, four_h), const),          # bias bwd
            bh_spec, bh_spec, bh_spec, bh_spec,        # h0f, c0f, h0b, c0b
        ],
        out_specs=(
            pl.BlockSpec((rows_blk, H), row_f),
            pl.BlockSpec((rows_blk, H), row_b),
            bh_spec, bh_spec, bh_spec, bh_spec,
        ),
        scratch_shapes=[pltpu.VMEM((B, H), jnp.float32)] * 4
                      + [pltpu.VMEM((rows_blk, four_h), jnp.float32)] * 2,
        compiler_params=pltpu.CompilerParams(
            dimension_semantics=("arbitrary",)),
        cost_estimate=cost,
    )(x2d, x2d, wih_f, wih_b, whh_f, whh_b, b_f, b_b, h0f, c0f, h0b, c0b)


# ---------------------------------------------------------------------------
# BiLSTM forward wrapper (eval mode, full-length time-major sequences)
# ---------------------------------------------------------------------------
def bilstm_forward(x, params, *, hidden_size, num_layers, hx=None,
                   time_chunk=16):
    """x: (T, B, input_size). Returns (out (T,B,2H), (h_n, c_n) (2L,B,H))."""
    T, B, _ = x.shape
    H = hidden_size
    C = max(1, min(time_chunk, T))
    n_chunks = -(-T // C)
    T_pad = n_chunks * C
    B_pad = max(8, _round_up(B, 8))

    if hx is None:
        h0_all = jnp.zeros((num_layers, 2, B_pad, H), jnp.float32)
        c0_all = jnp.zeros((num_layers, 2, B_pad, H), jnp.float32)
    else:
        h0_all = jnp.pad(hx[0].astype(jnp.float32).reshape(num_layers, 2, B, H),
                         ((0, 0), (0, 0), (0, B_pad - B), (0, 0)))
        c0_all = jnp.pad(hx[1].astype(jnp.float32).reshape(num_layers, 2, B, H),
                         ((0, 0), (0, 0), (0, B_pad - B), (0, 0)))

    # Pad once; padded rows/steps stay masked through every layer.
    layer_in = jnp.pad(x.astype(jnp.float32),
                       ((0, T_pad - T), (0, B_pad - B), (0, 0)))

    h_n, c_n = [], []
    for l in range(num_layers):
        wif, whf, bf = _prep_dir_params(params[l]["f"])
        wib, whb, bb = _prep_dir_params(params[l]["b"])
        x2d = layer_in.reshape(T_pad * B_pad, -1)
        out_f, out_b, hNf, cNf, hNb, cNb = _bilstm_layer(
            x2d, wif, wib, whf, whb, bf, bb,
            h0_all[l, 0], c0_all[l, 0], h0_all[l, 1], c0_all[l, 1],
            hidden_size=H, batch=B_pad, chunk=C, n_chunks=n_chunks, seq_len=T)
        h_n += [hNf[:B], hNb[:B]]
        c_n += [cNf[:B], cNb[:B]]
        layer_in = jnp.concatenate(
            [out_f.reshape(T_pad, B_pad, H), out_b.reshape(T_pad, B_pad, H)],
            axis=-1)                                   # (T_pad, B_pad, 2H)

    out = layer_in[:T, :B]
    return out, (jnp.stack(h_n), jnp.stack(c_n))


# ---------------------------------------------------------------------------
# Pure-JAX reference (mirrors torch.nn.LSTMCell / BiLSTM with hx=None, eval)
# ---------------------------------------------------------------------------
def _lstm_cell_ref(x_t, h, c, w_ih, w_hh, b_ih, b_hh):
    gates = x_t @ w_ih.T + b_ih + h @ w_hh.T + b_hh
    i, f, g, o = jnp.split(gates, 4, axis=-1)
    c_new = jax.nn.sigmoid(f) * c + jax.nn.sigmoid(i) * jnp.tanh(g)
    h_new = jax.nn.sigmoid(o) * jnp.tanh(c_new)
    return h_new, c_new


def bilstm_ref(x, params, *, hidden_size, num_layers):
    T, B, _ = x.shape
    h_n, c_n = [], []
    layer_in = x
    for l in range(num_layers):
        dir_outs = []
        for d, dkey in enumerate(("f", "b")):
            p = params[l][dkey]
            h = jnp.zeros((B, hidden_size), jnp.float32)
            c = jnp.zeros((B, hidden_size), jnp.float32)
            steps = range(T - 1, -1, -1) if d == 1 else range(T)
            ys = [None] * T
            for t in steps:
                h, c = _lstm_cell_ref(layer_in[t], h, c,
                                      p["w_ih"], p["w_hh"], p["b_ih"], p["b_hh"])
                ys[t] = h
            dir_outs.append(jnp.stack(ys))
            h_n.append(h)
            c_n.append(c)
        layer_in = jnp.concatenate(dir_outs, axis=-1)
    return layer_in, (jnp.stack(h_n), jnp.stack(c_n))


def init_params(key, input_size, hidden_size, num_layers):
    """PyTorch-layout parameters: w_ih (4H,in), w_hh (4H,H), zero biases."""
    params = []
    in_size = input_size
    for _ in range(num_layers):
        layer = {}
        for dkey in ("f", "b"):
            key, k1, k2 = jax.random.split(key, 3)
            layer[dkey] = dict(
                w_ih=0.1 * jax.random.normal(k1, (4 * hidden_size, in_size), jnp.float32),
                w_hh=0.1 * jax.random.normal(k2, (4 * hidden_size, hidden_size), jnp.float32),
                b_ih=jnp.zeros((4 * hidden_size,), jnp.float32),
                b_hh=jnp.zeros((4 * hidden_size,), jnp.float32),
            )
        params.append(layer)
        in_size = 2 * hidden_size
    return params


if __name__ == "__main__":
    T, B, IN, H, L = 8, 2, 32, 32, 2
    key = jax.random.PRNGKey(0)
    kx, kp = jax.random.split(key)
    x = jax.random.normal(kx, (T, B, IN), dtype=jnp.float32)
    params = init_params(kp, IN, H, L)

    out, (h_n, c_n) = bilstm_forward(x, params, hidden_size=H, num_layers=L)
    jax.block_until_ready((out, h_n, c_n))

    ref_out, (ref_h, ref_c) = bilstm_ref(x, params, hidden_size=H, num_layers=L)

    assert out.shape == (T, B, 2 * H)
    assert h_n.shape == (2 * L, B, H) and c_n.shape == (2 * L, B, H)
    np.testing.assert_allclose(np.asarray(out), np.asarray(ref_out), rtol=1e-4, atol=1e-4)
    np.testing.assert_allclose(np.asarray(h_n), np.asarray(ref_h), rtol=1e-4, atol=1e-4)
    np.testing.assert_allclose(np.asarray(c_n), np.asarray(ref_c), rtol=1e-4, atol=1e-4)

    print("KERNEL_OK")
</pallas_src>

<mosaic_0001>
module attributes {stable_mosaic.version = 11 : i64} {
  func.func @_bilstm_layer_kernel(%arg0: i32, %arg1: memref<64x32xf32, #tpu.memory_space<vmem>>, %arg2: memref<64x32xf32, #tpu.memory_space<vmem>>, %arg3: memref<32x128xf32, #tpu.memory_space<vmem>>, %arg4: memref<32x128xf32, #tpu.memory_space<vmem>>, %arg5: memref<32x128xf32, #tpu.memory_space<vmem>>, %arg6: memref<32x128xf32, #tpu.memory_space<vmem>>, %arg7: memref<1x128xf32, #tpu.memory_space<vmem>>, %arg8: memref<1x128xf32, #tpu.memory_space<vmem>>, %arg9: memref<8x32xf32, #tpu.memory_space<vmem>>, %arg10: memref<8x32xf32, #tpu.memory_space<vmem>>, %arg11: memref<8x32xf32, #tpu.memory_space<vmem>>, %arg12: memref<8x32xf32, #tpu.memory_space<vmem>>, %arg13: memref<64x32xf32, #tpu.memory_space<vmem>>, %arg14: memref<64x32xf32, #tpu.memory_space<vmem>>, %arg15: memref<8x32xf32, #tpu.memory_space<vmem>>, %arg16: memref<8x32xf32, #tpu.memory_space<vmem>>, %arg17: memref<8x32xf32, #tpu.memory_space<vmem>>, %arg18: memref<8x32xf32, #tpu.memory_space<vmem>>, %arg19: memref<8x32xf32, #tpu.memory_space<vmem>>, %arg20: memref<8x32xf32, #tpu.memory_space<vmem>>, %arg21: memref<8x32xf32, #tpu.memory_space<vmem>>, %arg22: memref<8x32xf32, #tpu.memory_space<vmem>>, %arg23: memref<64x128xf32, #tpu.memory_space<vmem>>, %arg24: memref<64x128xf32, #tpu.memory_space<vmem>>) attributes {dimension_semantics = [#tpu.dimension_semantics<arbitrary>], iteration_bounds = array<i64: 1>, scalar_prefetch = 0 : i64, scratch_operands = 6 : i64, tpu.core_type = #tpu.core_type<tc>, window_params = [{transform_indices = @transform_0, window_bounds = array<i64: 64, 32>}, {transform_indices = @transform_1, window_bounds = array<i64: 64, 32>}, {pipeline_mode = #tpu.pipeline_mode<synchronous>, transform_indices = @transform_2, window_bounds = array<i64: 32, 128>}, {pipeline_mode = #tpu.pipeline_mode<synchronous>, transform_indices = @transform_3, window_bounds = array<i64: 32, 128>}, {pipeline_mode = #tpu.pipeline_mode<synchronous>, transform_indices = @transform_4, window_bounds = array<i64: 32, 128>}, {pipeline_mode = #tpu.pipeline_mode<synchronous>, transform_indices = @transform_5, window_bounds = array<i64: 32, 128>}, {pipeline_mode = #tpu.pipeline_mode<synchronous>, transform_indices = @transform_6, window_bounds = array<i64: 1, 128>}, {pipeline_mode = #tpu.pipeline_mode<synchronous>, transform_indices = @transform_7, window_bounds = array<i64: 1, 128>}, {pipeline_mode = #tpu.pipeline_mode<synchronous>, transform_indices = @transform_8, window_bounds = array<i64: 8, 32>}, {pipeline_mode = #tpu.pipeline_mode<synchronous>, transform_indices = @transform_9, window_bounds = array<i64: 8, 32>}, {pipeline_mode = #tpu.pipeline_mode<synchronous>, transform_indices = @transform_10, window_bounds = array<i64: 8, 32>}, {pipeline_mode = #tpu.pipeline_mode<synchronous>, transform_indices = @transform_11, window_bounds = array<i64: 8, 32>}, {transform_indices = @transform_12, window_bounds = array<i64: 64, 32>}, {transform_indices = @transform_13, window_bounds = array<i64: 64, 32>}, {pipeline_mode = #tpu.pipeline_mode<synchronous>, transform_indices = @transform_14, window_bounds = array<i64: 8, 32>}, {pipeline_mode = #tpu.pipeline_mode<synchronous>, transform_indices = @transform_15, window_bounds = array<i64: 8, 32>}, {pipeline_mode = #tpu.pipeline_mode<synchronous>, transform_indices = @transform_16, window_bounds = array<i64: 8, 32>}, {pipeline_mode = #tpu.pipeline_mode<synchronous>, transform_indices = @transform_17, window_bounds = array<i64: 8, 32>}]} {
    %c0_i32 = arith.constant 0 : i32
    %0 = arith.cmpi eq, %arg0, %c0_i32 : i32
    %1 = arith.extui %0 : i1 to i32
    %c0_i32_0 = arith.constant 0 : i32
    %2 = arith.cmpi ne, %1, %c0_i32_0 : i32
    scf.if %2 {
      %c0_128 = arith.constant 0 : index
      %c0_129 = arith.constant 0 : index
      %422 = vector.load %arg9[%c0_128, %c0_129] : memref<8x32xf32, #tpu.memory_space<vmem>>, vector<8x32xf32>
      %c0_130 = arith.constant 0 : index
      %c0_131 = arith.constant 0 : index
      %423 = vector.load %arg19[%c0_130, %c0_131] : memref<8x32xf32, #tpu.memory_space<vmem>>, vector<8x32xf32>
      tpu.vector_store %arg19[%c0_130, %c0_131], %422 {strides = array<i32>} : memref<8x32xf32, #tpu.memory_space<vmem>>, vector<8x32xf32>,
      %c0_132 = arith.constant 0 : index
      %c0_133 = arith.constant 0 : index
      %424 = vector.load %arg10[%c0_132, %c0_133] : memref<8x32xf32, #tpu.memory_space<vmem>>, vector<8x32xf32>
      %c0_134 = arith.constant 0 : index
      %c0_135 = arith.constant 0 : index
      %425 = vector.load %arg20[%c0_134, %c0_135] : memref<8x32xf32, #tpu.memory_space<vmem>>, vector<8x32xf32>
      tpu.vector_store %arg20[%c0_134, %c0_135], %424 {strides = array<i32>} : memref<8x32xf32, #tpu.memory_space<vmem>>, vector<8x32xf32>,
      %c0_136 = arith.constant 0 : index
      %c0_137 = arith.constant 0 : index
      %426 = vector.load %arg11[%c0_136, %c0_137] : memref<8x32xf32, #tpu.memory_space<vmem>>, vector<8x32xf32>
      %c0_138 = arith.constant 0 : index
      %c0_139 = arith.constant 0 : index
      %427 = vector.load %arg21[%c0_138, %c0_139] : memref<8x32xf32, #tpu.memory_space<vmem>>, vector<8x32xf32>
      tpu.vector_store %arg21[%c0_138, %c0_139], %426 {strides = array<i32>} : memref<8x32xf32, #tpu.memory_space<vmem>>, vector<8x32xf32>,
      %c0_140 = arith.constant 0 : index
      %c0_141 = arith.constant 0 : index
      %428 = vector.load %arg12[%c0_140, %c0_141] : memref<8x32xf32, #tpu.memory_space<vmem>>, vector<8x32xf32>
      %c0_142 = arith.constant 0 : index
      %c0_143 = arith.constant 0 : index
      %429 = vector.load %arg22[%c0_142, %c0_143] : memref<8x32xf32, #tpu.memory_space<vmem>>, vector<8x32xf32>
      tpu.vector_store %arg22[%c0_142, %c0_143], %428 {strides = array<i32>} : memref<8x32xf32, #tpu.memory_space<vmem>>, vector<8x32xf32>,
    } else {
    }
    %c0 = arith.constant 0 : index
    %c0_1 = arith.constant 0 : index
    %3 = vector.load %arg1[%c0, %c0_1] : memref<64x32xf32, #tpu.memory_space<vmem>>, vector<64x32xf32>
    %c0_2 = arith.constant 0 : index
    %c0_3 = arith.constant 0 : index
    %4 = vector.load %arg3[%c0_2, %c0_3] : memref<32x128xf32, #tpu.memory_space<vmem>>, vector<32x128xf32>
    %cst = arith.constant dense<0.000000e+00> : vector<64x128xf32>
    %5 = tpu.matmul %3, %4, %cst {dimension_numbers = #tpu.dot_dimension_numbers<[1], [0], [0], [1], [0, 0, 1, 1], [], []>} : vector<64x32xf32>, vector<32x128xf32>, vector<64x128xf32> -> vector<64x128xf32>
    %c0_4 = arith.constant 0 : index
    %c0_5 = arith.constant 0 : index
    %6 = vector.load %arg7[%c0_4, %c0_5] : memref<1x128xf32, #tpu.memory_space<vmem>>, vector<1x128xf32>
    %7 = vector.broadcast %6 : vector<1x128xf32> to vector<64x128xf32>
    %8 = arith.addf %5, %7 : vector<64x128xf32>
    %c0_6 = arith.constant 0 : index
    %c0_7 = arith.constant 0 : index
    %9 = vector.load %arg23[%c0_6, %c0_7] : memref<64x128xf32, #tpu.memory_space<vmem>>, vector<64x128xf32>
    tpu.vector_store %arg23[%c0_6, %c0_7], %8 {strides = array<i32>} : memref<64x128xf32, #tpu.memory_space<vmem>>, vector<64x128xf32>,
    %c0_8 = arith.constant 0 : index
    %c0_9 = arith.constant 0 : index
    %10 = vector.load %arg2[%c0_8, %c0_9] : memref<64x32xf32, #tpu.memory_space<vmem>>, vector<64x32xf32>
    %c0_10 = arith.constant 0 : index
    %c0_11 = arith.constant 0 : index
    %11 = vector.load %arg4[%c0_10, %c0_11] : memref<32x128xf32, #tpu.memory_space<vmem>>, vector<32x128xf32>
    %cst_12 = arith.constant dense<0.000000e+00> : vector<64x128xf32>
    %12 = tpu.matmul %10, %11, %cst_12 {dimension_numbers = #tpu.dot_dimension_numbers<[1], [0], [0], [1], [0, 0, 1, 1], [], []>} : vector<64x32xf32>, vector<32x128xf32>, vector<64x128xf32> -> vector<64x128xf32>
    %c0_13 = arith.constant 0 : index
    %c0_14 = arith.constant 0 : index
    %13 = vector.load %arg8[%c0_13, %c0_14] : memref<1x128xf32, #tpu.memory_space<vmem>>, vector<1x128xf32>
    %14 = vector.broadcast %13 : vector<1x128xf32> to vector<64x128xf32>
    %15 = arith.addf %12, %14 : vector<64x128xf32>
    %c0_15 = arith.constant 0 : index
    %c0_16 = arith.constant 0 : index
    %16 = vector.load %arg24[%c0_15, %c0_16] : memref<64x128xf32, #tpu.memory_space<vmem>>, vector<64x128xf32>
    tpu.vector_store %arg24[%c0_15, %c0_16], %15 {strides = array<i32>} : memref<64x128xf32, #tpu.memory_space<vmem>>, vector<64x128xf32>,
    %c0_17 = arith.constant 0 : index
    %c0_18 = arith.constant 0 : index
    %17 = vector.load %arg5[%c0_17, %c0_18] : memref<32x128xf32, #tpu.memory_space<vmem>>, vector<32x128xf32>
    %c0_19 = arith.constant 0 : index
    %c0_20 = arith.constant 0 : index
    %18 = vector.load %arg6[%c0_19, %c0_20] : memref<32x128xf32, #tpu.memory_space<vmem>>, vector<32x128xf32>
    %c0_21 = arith.constant 0 : index
    %c0_22 = arith.constant 0 : index
    %19 = vector.load %arg19[%c0_21, %c0_22] : memref<8x32xf32, #tpu.memory_space<vmem>>, vector<8x32xf32>
    %c0_23 = arith.constant 0 : index
    %c0_24 = arith.constant 0 : index
    %20 = vector.load %arg20[%c0_23, %c0_24] : memref<8x32xf32, #tpu.memory_space<vmem>>, vector<8x32xf32>
    %c0_25 = arith.constant 0 : index
    %c0_26 = arith.constant 0 : index
    %21 = vector.load %arg21[%c0_25, %c0_26] : memref<8x32xf32, #tpu.memory_space<vmem>>, vector<8x32xf32>
    %c0_27 = arith.constant 0 : index
    %c0_28 = arith.constant 0 : index
    %22 = vector.load %arg22[%c0_27, %c0_28] : memref<8x32xf32, #tpu.memory_space<vmem>>, vector<8x32xf32>
    %c0_i32_29 = arith.constant 0 : i32
    %c7_i32 = arith.constant 7 : i32
    %23 = arith.subi %c7_i32, %c0_i32_29 : i32
    %c8_i32 = arith.constant 8 : i32
    %24 = arith.muli %c0_i32_29, %c8_i32 : i32
    %25 = tpu.assume_multiple %24, 8 : i32
    %c8_i32_30 = arith.constant 8 : i32
    %26 = arith.muli %23, %c8_i32_30 : i32
    %27 = tpu.assume_multiple %26, 8 : i32
    %28 = arith.index_cast %25 : i32 to index
    %c0_31 = arith.constant 0 : index
    %29 = vector.load %arg23[%28, %c0_31] : memref<64x128xf32, #tpu.memory_space<vmem>>, vector<8x128xf32>
    %cst_32 = arith.constant dense<0.000000e+00> : vector<8x128xf32>
    %30 = tpu.matmul %19, %17, %cst_32 {dimension_numbers = #tpu.dot_dimension_numbers<[1], [0], [0], [1], [0, 0, 1, 1], [], []>} : vector<8x32xf32>, vector<32x128xf32>, vector<8x128xf32> -> vector<8x128xf32>
    %31 = arith.addf %29, %30 : vector<8x128xf32>
    %32 = arith.index_cast %27 : i32 to index
    %c0_33 = arith.constant 0 : index
    %33 = vector.load %arg24[%32, %c0_33] : memref<64x128xf32, #tpu.memory_space<vmem>>, vector<8x128xf32>
    %cst_34 = arith.constant dense<0.000000e+00> : vector<8x128xf32>
    %34 = tpu.matmul %21, %18, %cst_34 {dimension_numbers = #tpu.dot_dimension_numbers<[1], [0], [0], [1], [0, 0, 1, 1], [], []>} : vector<8x32xf32>, vector<32x128xf32>, vector<8x128xf32> -> vector<8x128xf32>
    %35 = arith.addf %33, %34 : vector<8x128xf32>
    %36 = vector.extract_strided_slice %31 {offsets = [0, 0], sizes = [8, 96], strides = [1, 1]} : vector<8x128xf32> to vector<8x96xf32>
    %37 = arith.negf %36 : vector<8x96xf32>
    %38 = math.exp %37 : vector<8x96xf32>
    %cst_35 = arith.constant 1.000000e+00 : f32
    %39 = vector.broadcast %cst_35 : f32 to vector<8x96xf32>
    %40 = arith.addf %39, %38 : vector<8x96xf32>
    %41 = arith.divf %39, %40 : vector<8x96xf32>
    %42 = vector.extract_strided_slice %41 {offsets = [0, 0], sizes = [8, 32], strides = [1, 1]} : vector<8x96xf32> to vector<8x32xf32>
    %43 = vector.extract_strided_slice %41 {offsets = [0, 32], sizes = [8, 32], strides = [1, 1]} : vector<8x96xf32> to vector<8x32xf32>
    %44 = vector.extract_strided_slice %41 {offsets = [0, 64], sizes = [8, 32], strides = [1, 1]} : vector<8x96xf32> to vector<8x32xf32>
    %45 = vector.extract_strided_slice %31 {offsets = [0, 96], sizes = [8, 32], strides = [1, 1]} : vector<8x128xf32> to vector<8x32xf32>
    %46 = math.tanh %45 : vector<8x32xf32>
    %47 = arith.mulf %43, %20 : vector<8x32xf32>
    %48 = arith.mulf %42, %46 : vector<8x32xf32>
    %49 = arith.addf %47, %48 : vector<8x32xf32>
    %50 = math.tanh %49 : vector<8x32xf32>
    %51 = arith.mulf %44, %50 : vector<8x32xf32>
    %52 = vector.extract_strided_slice %35 {offsets = [0, 0], sizes = [8, 96], strides = [1, 1]} : vector<8x128xf32> to vector<8x96xf32>
    %53 = arith.negf %52 : vector<8x96xf32>
    %54 = math.exp %53 : vector<8x96xf32>
    %cst_36 = arith.constant 1.000000e+00 : f32
    %55 = vector.broadcast %cst_36 : f32 to vector<8x96xf32>
    %56 = arith.addf %55, %54 : vector<8x96xf32>
    %57 = arith.divf %55, %56 : vector<8x96xf32>
    %58 = vector.extract_strided_slice %57 {offsets = [0, 0], sizes = [8, 32], strides = [1, 1]} : vector<8x96xf32> to vector<8x32xf32>
    %59 = vector.extract_strided_slice %57 {offsets = [0, 32], sizes = [8, 32], strides = [1, 1]} : vector<8x96xf32> to vector<8x32xf32>
    %60 = vector.extract_strided_slice %57 {offsets = [0, 64], sizes = [8, 32], strides = [1, 1]} : vector<8x96xf32> to vector<8x32xf32>
    %61 = vector.extract_strided_slice %35 {offsets = [0, 96], sizes = [8, 32], strides = [1, 1]} : vector<8x128xf32> to vector<8x32xf32>
    %62 = math.tanh %61 : vector<8x32xf32>
    %63 = arith.mulf %59, %22 : vector<8x32xf32>
    %64 = arith.mulf %58, %62 : vector<8x32xf32>
    %65 = arith.addf %63, %64 : vector<8x32xf32>
    %66 = math.tanh %65 : vector<8x32xf32>
    %67 = arith.mulf %60, %66 : vector<8x32xf32>
    %68 = arith.index_cast %25 : i32 to index
    %c0_37 = arith.constant 0 : index
    %69 = vector.load %arg13[%68, %c0_37] : memref<64x32xf32, #tpu.memory_space<vmem>>, vector<8x32xf32>
    tpu.vector_store %arg13[%68, %c0_37], %51 {strides = array<i32>} : memref<64x32xf32, #tpu.memory_space<vmem>>, vector<8x32xf32>,
    %70 = arith.index_cast %27 : i32 to index
    %c0_38 = arith.constant 0 : index
    %71 = vector.load %arg14[%70, %c0_38] : memref<64x32xf32, #tpu.memory_space<vmem>>, vector<8x32xf32>
    tpu.vector_store %arg14[%70, %c0_38], %67 {strides = array<i32>} : memref<64x32xf32, #tpu.memory_space<vmem>>, vector<8x32xf32>,
    %c1_i32 = arith.constant 1 : i32
    %c7_i32_39 = arith.constant 7 : i32
    %72 = arith.subi %c7_i32_39, %c1_i32 : i32
    %c8_i32_40 = arith.constant 8 : i32
    %73 = arith.muli %c1_i32, %c8_i32_40 : i32
    %74 = tpu.assume_multiple %73, 8 : i32
    %c8_i32_41 = arith.constant 8 : i32
    %75 = arith.muli %72, %c8_i32_41 : i32
    %76 = tpu.assume_multiple %75, 8 : i32
    %77 = arith.index_cast %74 : i32 to index
    %c0_42 = arith.constant 0 : index
    %78 = vector.load %arg23[%77, %c0_42] : memref<64x128xf32, #tpu.memory_space<vmem>>, vector<8x128xf32>
    %cst_43 = arith.constant dense<0.000000e+00> : vector<8x128xf32>
    %79 = tpu.matmul %51, %17, %cst_43 {dimension_numbers = #tpu.dot_dimension_numbers<[1], [0], [0], [1], [0, 0, 1, 1], [], []>} : vector<8x32xf32>, vector<32x128xf32>, vector<8x128xf32> -> vector<8x128xf32>
    %80 = arith.addf %78, %79 : vector<8x128xf32>
    %81 = arith.index_cast %76 : i32 to index
    %c0_44 = arith.constant 0 : index
    %82 = vector.load %arg24[%81, %c0_44] : memref<64x128xf32, #tpu.memory_space<vmem>>, vector<8x128xf32>
    %cst_45 = arith.constant dense<0.000000e+00> : vector<8x128xf32>
    %83 = tpu.matmul %67, %18, %cst_45 {dimension_numbers = #tpu.dot_dimension_numbers<[1], [0], [0], [1], [0, 0, 1, 1], [], []>} : vector<8x32xf32>, vector<32x128xf32>, vector<8x128xf32> -> vector<8x128xf32>
    %84 = arith.addf %82, %83 : vector<8x128xf32>
    %85 = vector.extract_strided_slice %80 {offsets = [0, 0], sizes = [8, 96], strides = [1, 1]} : vector<8x128xf32> to vector<8x96xf32>
    %86 = arith.negf %85 : vector<8x96xf32>
    %87 = math.exp %86 : vector<8x96xf32>
    %cst_46 = arith.constant 1.000000e+00 : f32
    %88 = vector.broadcast %cst_46 : f32 to vector<8x96xf32>
    %89 = arith.addf %88, %87 : vector<8x96xf32>
    %90 = arith.divf %88, %89 : vector<8x96xf32>
    %91 = vector.extract_strided_slice %90 {offsets = [0, 0], sizes = [8, 32], strides = [1, 1]} : vector<8x96xf32> to vector<8x32xf32>
    %92 = vector.extract_strided_slice %90 {offsets = [0, 32], sizes = [8, 32], strides = [1, 1]} : vector<8x96xf32> to vector<8x32xf32>
    %93 = vector.extract_strided_slice %90 {offsets = [0, 64], sizes = [8, 32], strides = [1, 1]} : vector<8x96xf32> to vector<8x32xf32>
    %94 = vector.extract_strided_slice %80 {offsets = [0, 96], sizes = [8, 32], strides = [1, 1]} : vector<8x128xf32> to vector<8x32xf32>
    %95 = math.tanh %94 : vector<8x32xf32>
    %96 = arith.mulf %92, %49 : vector<8x32xf32>
    %97 = arith.mulf %91, %95 : vector<8x32xf32>
    %98 = arith.addf %96, %97 : vector<8x32xf32>
    %99 = math.tanh %98 : vector<8x32xf32>
    %100 = arith.mulf %93, %99 : vector<8x32xf32>
    %101 = vector.extract_strided_slice %84 {offsets = [0, 0], sizes = [8, 96], strides = [1, 1]} : vector<8x128xf32> to vector<8x96xf32>
    %102 = arith.negf %101 : vector<8x96xf32>
    %103 = math.exp %102 : vector<8x96xf32>
    %cst_47 = arith.constant 1.000000e+00 : f32
    %104 = vector.broadcast %cst_47 : f32 to vector<8x96xf32>
    %105 = arith.addf %104, %103 : vector<8x96xf32>
    %106 = arith.divf %104, %105 : vector<8x96xf32>
    %107 = vector.extract_strided_slice %106 {offsets = [0, 0], sizes = [8, 32], strides = [1, 1]} : vector<8x96xf32> to vector<8x32xf32>
    %108 = vector.extract_strided_slice %106 {offsets = [0, 32], sizes = [8, 32], strides = [1, 1]} : vector<8x96xf32> to vector<8x32xf32>
    %109 = vector.extract_strided_slice %106 {offsets = [0, 64], sizes = [8, 32], strides = [1, 1]} : vector<8x96xf32> to vector<8x32xf32>
    %110 = vector.extract_strided_slice %84 {offsets = [0, 96], sizes = [8, 32], strides = [1, 1]} : vector<8x128xf32> to vector<8x32xf32>
    %111 = math.tanh %110 : vector<8x32xf32>
    %112 = arith.mulf %108, %65 : vector<8x32xf32>
    %113 = arith.mulf %107, %111 : vector<8x32xf32>
    %114 = arith.addf %112, %113 : vector<8x32xf32>
    %115 = math.tanh %114 : vector<8x32xf32>
    %116 = arith.mulf %109, %115 : vector<8x32xf32>
    %117 = arith.index_cast %74 : i32 to index
    %c0_48 = arith.constant 0 : index
    %118 = vector.load %arg13[%117, %c0_48] : memref<64x32xf32, #tpu.memory_space<vmem>>, vector<8x32xf32>
    tpu.vector_store %arg13[%117, %c0_48], %100 {strides = array<i32>} : memref<64x32xf32, #tpu.memory_space<vmem>>, vector<8x32xf32>,
    %119 = arith.index_cast %76 : i32 to index
    %c0_49 = arith.constant 0 : index
    %120 = vector.load %arg14[%119, %c0_49] : memref<64x32xf32, #tpu.memory_space<vmem>>, vector<8x32xf32>
    tpu.vector_store %arg14[%119, %c0_49], %116 {strides = array<i32>} : memref<64x32xf32, #tpu.memory_space<vmem>>, vector<8x32xf32>,
    %c2_i32 = arith.constant 2 : i32
    %c7_i32_50 = arith.constant 7 : i32
    %121 = arith.subi %c7_i32_50, %c2_i32 : i32
    %c8_i32_51 = arith.constant 8 : i32
    %122 = arith.muli %c2_i32, %c8_i32_51 : i32
    %123 = tpu.assume_multiple %122, 8 : i32
    %c8_i32_52 = arith.constant 8 : i32
    %124 = arith.muli %121, %c8_i32_52 : i32
    %125 = tpu.assume_multiple %124, 8 : i32
    %126 = arith.index_cast %123 : i32 to index
    %c0_53 = arith.constant 0 : index
    %127 = vector.load %arg23[%126, %c0_53] : memref<64x128xf32, #tpu.memory_space<vmem>>, vector<8x128xf32>
    %cst_54 = arith.constant dense<0.000000e+00> : vector<8x128xf32>
    %128 = tpu.matmul %100, %17, %cst_54 {dimension_numbers = #tpu.dot_dimension_numbers<[1], [0], [0], [1], [0, 0, 1, 1], [], []>} : vector<8x32xf32>, vector<32x128xf32>, vector<8x128xf32> -> vector<8x128xf32>
    %129 = arith.addf %127, %128 : vector<8x128xf32>
    %130 = arith.index_cast %125 : i32 to index
    %c0_55 = arith.constant 0 : index
    %131 = vector.load %arg24[%130, %c0_55] : memref<64x128xf32, #tpu.memory_space<vmem>>, vector<8x128xf32>
    %cst_56 = arith.constant dense<0.000000e+00> : vector<8x128xf32>
    %132 = tpu.matmul %116, %18, %cst_56 {dimension_numbers = #tpu.dot_dimension_numbers<[1], [0], [0], [1], [0, 0, 1, 1], [], []>} : vector<8x32xf32>, vector<32x128xf32>, vector<8x128xf32> -> vector<8x128xf32>
    %133 = arith.addf %131, %132 : vector<8x128xf32>
    %134 = vector.extract_strided_slice %129 {offsets = [0, 0], sizes = [8, 96], strides = [1, 1]} : vector<8x128xf32> to vector<8x96xf32>
    %135 = arith.negf %134 : vector<8x96xf32>
    %136 = math.exp %135 : vector<8x96xf32>
    %cst_57 = arith.constant 1.000000e+00 : f32
    %137 = vector.broadcast %cst_57 : f32 to vector<8x96xf32>
    %138 = arith.addf %137, %136 : vector<8x96xf32>
    %139 = arith.divf %137, %138 : vector<8x96xf32>
    %140 = vector.extract_strided_slice %139 {offsets = [0, 0], sizes = [8, 32], strides = [1, 1]} : vector<8x96xf32> to vector<8x32xf32>
    %141 = vector.extract_strided_slice %139 {offsets = [0, 32], sizes = [8, 32], strides = [1, 1]} : vector<8x96xf32> to vector<8x32xf32>
    %142 = vector.extract_strided_slice %139 {offsets = [0, 64], sizes = [8, 32], strides = [1, 1]} : vector<8x96xf32> to vector<8x32xf32>
    %143 = vector.extract_strided_slice %129 {offsets = [0, 96], sizes = [8, 32], strides = [1, 1]} : vector<8x128xf32> to vector<8x32xf32>
    %144 = math.tanh %143 : vector<8x32xf32>
    %145 = arith.mulf %141, %98 : vector<8x32xf32>
    %146 = arith.mulf %140, %144 : vector<8x32xf32>
    %147 = arith.addf %145, %146 : vector<8x32xf32>
    %148 = math.tanh %147 : vector<8x32xf32>
    %149 = arith.mulf %142, %148 : vector<8x32xf32>
    %150 = vector.extract_strided_slice %133 {offsets = [0, 0], sizes = [8, 96], strides = [1, 1]} : vector<8x128xf32> to vector<8x96xf32>
    %151 = arith.negf %150 : vector<8x96xf32>
    %152 = math.exp %151 : vector<8x96xf32>
    %cst_58 = arith.constant 1.000000e+00 : f32
    %153 = vector.broadcast %cst_58 : f32 to vector<8x96xf32>
    %154 = arith.addf %153, %152 : vector<8x96xf32>
    %155 = arith.divf %153, %154 : vector<8x96xf32>
    %156 = vector.extract_strided_slice %155 {offsets = [0, 0], sizes = [8, 32], strides = [1, 1]} : vector<8x96xf32> to vector<8x32xf32>
    %157 = vector.extract_strided_slice %155 {offsets = [0, 32], sizes = [8, 32], strides = [1, 1]} : vector<8x96xf32> to vector<8x32xf32>
    %158 = vector.extract_strided_slice %155 {offsets = [0, 64], sizes = [8, 32], strides = [1, 1]} : vector<8x96xf32> to vector<8x32xf32>
    %159 = vector.extract_strided_slice %133 {offsets = [0, 96], sizes = [8, 32], strides = [1, 1]} : vector<8x128xf32> to vector<8x32xf32>
    %160 = math.tanh %159 : vector<8x32xf32>
    %161 = arith.mulf %157, %114 : vector<8x32xf32>
    %162 = arith.mulf %156, %160 : vector<8x32xf32>
    %163 = arith.addf %161, %162 : vector<8x32xf32>
    %164 = math.tanh %163 : vector<8x32xf32>
    %165 = arith.mulf %158, %164 : vector<8x32xf32>
    %166 = arith.index_cast %123 : i32 to index
    %c0_59 = arith.constant 0 : index
    %167 = vector.load %arg13[%166, %c0_59] : memref<64x32xf32, #tpu.memory_space<vmem>>, vector<8x32xf32>
    tpu.vector_store %arg13[%166, %c0_59], %149 {strides = array<i32>} : memref<64x32xf32, #tpu.memory_space<vmem>>, vector<8x32xf32>,
    %168 = arith.index_cast %125 : i32 to index
    %c0_60 = arith.constant 0 : index
    %169 = vector.load %arg14[%168, %c0_60] : memref<64x32xf32, #tpu.memory_space<vmem>>, vector<8x32xf32>
    tpu.vector_store %arg14[%168, %c0_60], %165 {strides = array<i32>} : memref<64x32xf32, #tpu.memory_space<vmem>>, vector<8x32xf32>,
    %c3_i32 = arith.constant 3 : i32
    %c7_i32_61 = arith.constant 7 : i32
    %170 = arith.subi %c7_i32_61, %c3_i32 : i32
    %c8_i32_62 = arith.constant 8 : i32
    %171 = arith.muli %c3_i32, %c8_i32_62 : i32
    %172 = tpu.assume_multiple %171, 8 : i32
    %c8_i32_63 = arith.constant 8 : i32
    %173 = arith.muli %170, %c8_i32_63 : i32
    %174 = tpu.assume_multiple %173, 8 : i32
    %175 = arith.index_cast %172 : i32 to index
    %c0_64 = arith.constant 0 : index
    %176 = vector.load %arg23[%175, %c0_64] : memref<64x128xf32, #tpu.memory_space<vmem>>, vector<8x128xf32>
    %cst_65 = arith.constant dense<0.000000e+00> : vector<8x128xf32>
    %177 = tpu.matmul %149, %17, %cst_65 {dimension_numbers = #tpu.dot_dimension_numbers<[1], [0], [0], [1], [0, 0, 1, 1], [], []>} : vector<8x32xf32>, vector<32x128xf32>, vector<8x128xf32> -> vector<8x128xf32>
    %178 = arith.addf %176, %177 : vector<8x128xf32>
    %179 = arith.index_cast %174 : i32 to index
    %c0_66 = arith.constant 0 : index
    %180 = vector.load %arg24[%179, %c0_66] : memref<64x128xf32, #tpu.memory_space<vmem>>, vector<8x128xf32>
    %cst_67 = arith.constant dense<0.000000e+00> : vector<8x128xf32>
    %181 = tpu.matmul %165, %18, %cst_67 {dimension_numbers = #tpu.dot_dimension_numbers<[1], [0], [0], [1], [0, 0, 1, 1], [], []>} : vector<8x32xf32>, vector<32x128xf32>, vector<8x128xf32> -> vector<8x128xf32>
    %182 = arith.addf %180, %181 : vector<8x128xf32>
    %183 = vector.extract_strided_slice %178 {offsets = [0, 0], sizes = [8, 96], strides = [1, 1]} : vector<8x128xf32> to vector<8x96xf32>
    %184 = arith.negf %183 : vector<8x96xf32>
    %185 = math.exp %184 : vector<8x96xf32>
    %cst_68 = arith.constant 1.000000e+00 : f32
    %186 = vector.broadcast %cst_68 : f32 to vector<8x96xf32>
    %187 = arith.addf %186, %185 : vector<8x96xf32>
    %188 = arith.divf %186, %187 : vector<8x96xf32>
    %189 = vector.extract_strided_slice %188 {offsets = [0, 0], sizes = [8, 32], strides = [1, 1]} : vector<8x96xf32> to vector<8x32xf32>
    %190 = vector.extract_strided_slice %188 {offsets = [0, 32], sizes = [8, 32], strides = [1, 1]} : vector<8x96xf32> to vector<8x32xf32>
    %191 = vector.extract_strided_slice %188 {offsets = [0, 64], sizes = [8, 32], strides = [1, 1]} : vector<8x96xf32> to vector<8x32xf32>
    %192 = vector.extract_strided_slice %178 {offsets = [0, 96], sizes = [8, 32], strides = [1, 1]} : vector<8x128xf32> to vector<8x32xf32>
    %193 = math.tanh %192 : vector<8x32xf32>
    %194 = arith.mulf %190, %147 : vector<8x32xf32>
    %195 = arith.mulf %189, %193 : vector<8x32xf32>
    %196 = arith.addf %194, %195 : vector<8x32xf32>
    %197 = math.tanh %196 : vector<8x32xf32>
    %198 = arith.mulf %191, %197 : vector<8x32xf32>
    %199 = vector.extract_strided_slice %182 {offsets = [0, 0], sizes = [8, 96], strides = [1, 1]} : vector<8x128xf32> to vector<8x96xf32>
    %200 = arith.negf %199 : vector<8x96xf32>
    %201 = math.exp %200 : vector<8x96xf32>
    %cst_69 = arith.constant 1.000000e+00 : f32
    %202 = vector.broadcast %cst_69 : f32 to vector<8x96xf32>
    %203 = arith.addf %202, %201 : vector<8x96xf32>
    %204 = arith.divf %202, %203 : vector<8x96xf32>
    %205 = vector.extract_strided_slice %204 {offsets = [0, 0], sizes = [8, 32], strides = [1, 1]} : vector<8x96xf32> to vector<8x32xf32>
    %206 = vector.extract_strided_slice %204 {offsets = [0, 32], sizes = [8, 32], strides = [1, 1]} : vector<8x96xf32> to vector<8x32xf32>
    %207 = vector.extract_strided_slice %204 {offsets = [0, 64], sizes = [8, 32], strides = [1, 1]} : vector<8x96xf32> to vector<8x32xf32>
    %208 = vector.extract_strided_slice %182 {offsets = [0, 96], sizes = [8, 32], strides = [1, 1]} : vector<8x128xf32> to vector<8x32xf32>
    %209 = math.tanh %208 : vector<8x32xf32>
    %210 = arith.mulf %206, %163 : vector<8x32xf32>
    %211 = arith.mulf %205, %209 : vector<8x32xf32>
    %212 = arith.addf %210, %211 : vector<8x32xf32>
    %213 = math.tanh %212 : vector<8x32xf32>
    %214 = arith.mulf %207, %213 : vector<8x32xf32>
    %215 = arith.index_cast %172 : i32 to index
    %c0_70 = arith.constant 0 : index
    %216 = vector.load %arg13[%215, %c0_70] : memref<64x32xf32, #tpu.memory_space<vmem>>, vector<8x32xf32>
    tpu.vector_store %arg13[%215, %c0_70], %198 {strides = array<i32>} : memref<64x32xf32, #tpu.memory_space<vmem>>, vector<8x32xf32>,
    %217 = arith.index_cast %174 : i32 to index
    %c0_71 = arith.constant 0 : index
    %218 = vector.load %arg14[%217, %c0_71] : memref<64x32xf32, #tpu.memory_space<vmem>>, vector<8x32xf32>
    tpu.vector_store %arg14[%217, %c0_71], %214 {strides = array<i32>} : memref<64x32xf32, #tpu.memory_space<vmem>>, vector<8x32xf32>,
    %c4_i32 = arith.constant 4 : i32
    %c7_i32_72 = arith.constant 7 : i32
    %219 = arith.subi %c7_i32_72, %c4_i32 : i32
    %c8_i32_73 = arith.constant 8 : i32
    %220 = arith.muli %c4_i32, %c8_i32_73 : i32
    %221 = tpu.assume_multiple %220, 8 : i32
    %c8_i32_74 = arith.constant 8 : i32
    %222 = arith.muli %219, %c8_i32_74 : i32
    %223 = tpu.assume_multiple %222, 8 : i32
    %224 = arith.index_cast %221 : i32 to index
    %c0_75 = arith.constant 0 : index
    %225 = vector.load %arg23[%224, %c0_75] : memref<64x128xf32, #tpu.memory_space<vmem>>, vector<8x128xf32>
    %cst_76 = arith.constant dense<0.000000e+00> : vector<8x128xf32>
    %226 = tpu.matmul %198, %17, %cst_76 {dimension_numbers = #tpu.dot_dimension_numbers<[1], [0], [0], [1], [0, 0, 1, 1], [], []>} : vector<8x32xf32>, vector<32x128xf32>, vector<8x128xf32> -> vector<8x128xf32>
    %227 = arith.addf %225, %226 : vector<8x128xf32>
    %228 = arith.index_cast %223 : i32 to index
    %c0_77 = arith.constant 0 : index
    %229 = vector.load %arg24[%228, %c0_77] : memref<64x128xf32, #tpu.memory_space<vmem>>, vector<8x128xf32>
    %cst_78 = arith.constant dense<0.000000e+00> : vector<8x128xf32>
    %230 = tpu.matmul %214, %18, %cst_78 {dimension_numbers = #tpu.dot_dimension_numbers<[1], [0], [0], [1], [0, 0, 1, 1], [], []>} : vector<8x32xf32>, vector<32x128xf32>, vector<8x128xf32> -> vector<8x128xf32>
    %231 = arith.addf %229, %230 : vector<8x128xf32>
    %232 = vector.extract_strided_slice %227 {offsets = [0, 0], sizes = [8, 96], strides = [1, 1]} : vector<8x128xf32> to vector<8x96xf32>
    %233 = arith.negf %232 : vector<8x96xf32>
    %234 = math.exp %233 : vector<8x96xf32>
    %cst_79 = arith.constant 1.000000e+00 : f32
    %235 = vector.broadcast %cst_79 : f32 to vector<8x96xf32>
    %236 = arith.addf %235, %234 : vector<8x96xf32>
    %237 = arith.divf %235, %236 : vector<8x96xf32>
    %238 = vector.extract_strided_slice %237 {offsets = [0, 0], sizes = [8, 32], strides = [1, 1]} : vector<8x96xf32> to vector<8x32xf32>
    %239 = vector.extract_strided_slice %237 {offsets = [0, 32], sizes = [8, 32], strides = [1, 1]} : vector<8x96xf32> to vector<8x32xf32>
    %240 = vector.extract_strided_slice %237 {offsets = [0, 64], sizes = [8, 32], strides = [1, 1]} : vector<8x96xf32> to vector<8x32xf32>
    %241 = vector.extract_strided_slice %227 {offsets = [0, 96], sizes = [8, 32], strides = [1, 1]} : vector<8x128xf32> to vector<8x32xf32>
    %242 = math.tanh %241 : vector<8x32xf32>
    %243 = arith.mulf %239, %196 : vector<8x32xf32>
    %244 = arith.mulf %238, %242 : vector<8x32xf32>
    %245 = arith.addf %243, %244 : vector<8x32xf32>
    %246 = math.tanh %245 : vector<8x32xf32>
    %247 = arith.mulf %240, %246 : vector<8x32xf32>
    %248 = vector.extract_strided_slice %231 {offsets = [0, 0], sizes = [8, 96], strides = [1, 1]} : vector<8x128xf32> to vector<8x96xf32>
    %249 = arith.negf %248 : vector<8x96xf32>
    %250 = math.exp %249 : vector<8x96xf32>
    %cst_80 = arith.constant 1.000000e+00 : f32
    %251 = vector.broadcast %cst_80 : f32 to vector<8x96xf32>
    %252 = arith.addf %251, %250 : vector<8x96xf32>
    %253 = arith.divf %251, %252 : vector<8x96xf32>
    %254 = vector.extract_strided_slice %253 {offsets = [0, 0], sizes = [8, 32], strides = [1, 1]} : vector<8x96xf32> to vector<8x32xf32>
    %255 = vector.extract_strided_slice %253 {offsets = [0, 32], sizes = [8, 32], strides = [1, 1]} : vector<8x96xf32> to vector<8x32xf32>
    %256 = vector.extract_strided_slice %253 {offsets = [0, 64], sizes = [8, 32], strides = [1, 1]} : vector<8x96xf32> to vector<8x32xf32>
    %257 = vector.extract_strided_slice %231 {offsets = [0, 96], sizes = [8, 32], strides = [1, 1]} : vector<8x128xf32> to vector<8x32xf32>
    %258 = math.tanh %257 : vector<8x32xf32>
    %259 = arith.mulf %255, %212 : vector<8x32xf32>
    %260 = arith.mulf %254, %258 : vector<8x32xf32>
    %261 = arith.addf %259, %260 : vector<8x32xf32>
    %262 = math.tanh %261 : vector<8x32xf32>
    %263 = arith.mulf %256, %262 : vector<8x32xf32>
    %264 = arith.index_cast %221 : i32 to index
    %c0_81 = arith.constant 0 : index
    %265 = vector.load %arg13[%264, %c0_81] : memref<64x32xf32, #tpu.memory_space<vmem>>, vector<8x32xf32>
    tpu.vector_store %arg13[%264, %c0_81], %247 {strides = array<i32>} : memref<64x32xf32, #tpu.memory_space<vmem>>, vector<8x32xf32>,
    %266 = arith.index_cast %223 : i32 to index
    %c0_82 = arith.constant 0 : index
    %267 = vector.load %arg14[%266, %c0_82] : memref<64x32xf32, #tpu.memory_space<vmem>>, vector<8x32xf32>
    tpu.vector_store %arg14[%266, %c0_82], %263 {strides = array<i32>} : memref<64x32xf32, #tpu.memory_space<vmem>>, vector<8x32xf32>,
    %c5_i32 = arith.constant 5 : i32
    %c7_i32_83 = arith.constant 7 : i32
    %268 = arith.subi %c7_i32_83, %c5_i32 : i32
    %c8_i32_84 = arith.constant 8 : i32
    %269 = arith.muli %c5_i32, %c8_i32_84 : i32
    %270 = tpu.assume_multiple %269, 8 : i32
    %c8_i32_85 = arith.constant 8 : i32
    %271 = arith.muli %268, %c8_i32_85 : i32
    %272 = tpu.assume_multiple %271, 8 : i32
    %273 = arith.index_cast %270 : i32 to index
    %c0_86 = arith.constant 0 : index
    %274 = vector.load %arg23[%273, %c0_86] : memref<64x128xf32, #tpu.memory_space<vmem>>, vector<8x128xf32>
    %cst_87 = arith.constant dense<0.000000e+00> : vector<8x128xf32>
    %275 = tpu.matmul %247, %17, %cst_87 {dimension_numbers = #tpu.dot_dimension_numbers<[1], [0], [0], [1], [0, 0, 1, 1], [], []>} : vector<8x32xf32>, vector<32x128xf32>, vector<8x128xf32> -> vector<8x128xf32>
    %276 = arith.addf %274, %275 : vector<8x128xf32>
    %277 = arith.index_cast %272 : i32 to index
    %c0_88 = arith.constant 0 : index
    %278 = vector.load %arg24[%277, %c0_88] : memref<64x128xf32, #tpu.memory_space<vmem>>, vector<8x128xf32>
    %cst_89 = arith.constant dense<0.000000e+00> : vector<8x128xf32>
    %279 = tpu.matmul %263, %18, %cst_89 {dimension_numbers = #tpu.dot_dimension_numbers<[1], [0], [0], [1], [0, 0, 1, 1], [], []>} : vector<8x32xf32>, vector<32x128xf32>, vector<8x128xf32> -> vector<8x128xf32>
    %280 = arith.addf %278, %279 : vector<8x128xf32>
    %281 = vector.extract_strided_slice %276 {offsets = [0, 0], sizes = [8, 96], strides = [1, 1]} : vector<8x128xf32> to vector<8x96xf32>
    %282 = arith.negf %281 : vector<8x96xf32>
    %283 = math.exp %282 : vector<8x96xf32>
    %cst_90 = arith.constant 1.000000e+00 : f32
    %284 = vector.broadcast %cst_90 : f32 to vector<8x96xf32>
    %285 = arith.addf %284, %283 : vector<8x96xf32>
    %286 = arith.divf %284, %285 : vector<8x96xf32>
    %287 = vector.extract_strided_slice %286 {offsets = [0, 0], sizes = [8, 32], strides = [1, 1]} : vector<8x96xf32> to vector<8x32xf32>
    %288 = vector.extract_strided_slice %286 {offsets = [0, 32], sizes = [8, 32], strides = [1, 1]} : vector<8x96xf32> to vector<8x32xf32>
    %289 = vector.extract_strided_slice %286 {offsets = [0, 64], sizes = [8, 32], strides = [1, 1]} : vector<8x96xf32> to vector<8x32xf32>
    %290 = vector.extract_strided_slice %276 {offsets = [0, 96], sizes = [8, 32], strides = [1, 1]} : vector<8x128xf32> to vector<8x32xf32>
    %291 = math.tanh %290 : vector<8x32xf32>
    %292 = arith.mulf %288, %245 : vector<8x32xf32>
    %293 = arith.mulf %287, %291 : vector<8x32xf32>
    %294 = arith.addf %292, %293 : vector<8x32xf32>
    %295 = math.tanh %294 : vector<8x32xf32>
    %296 = arith.mulf %289, %295 : vector<8x32xf32>
    %297 = vector.extract_strided_slice %280 {offsets = [0, 0], sizes = [8, 96], strides = [1, 1]} : vector<8x128xf32> to vector<8x96xf32>
    %298 = arith.negf %297 : vector<8x96xf32>
    %299 = math.exp %298 : vector<8x96xf32>
    %cst_91 = arith.constant 1.000000e+00 : f32
    %300 = vector.broadcast %cst_91 : f32 to vector<8x96xf32>
    %301 = arith.addf %300, %299 : vector<8x96xf32>
    %302 = arith.divf %300, %301 : vector<8x96xf32>
    %303 = vector.extract_strided_slice %302 {offsets = [0, 0], sizes = [8, 32], strides = [1, 1]} : vector<8x96xf32> to vector<8x32xf32>
    %304 = vector.extract_strided_slice %302 {offsets = [0, 32], sizes = [8, 32], strides = [1, 1]} : vector<8x96xf32> to vector<8x32xf32>
    %305 = vector.extract_strided_slice %302 {offsets = [0, 64], sizes = [8, 32], strides = [1, 1]} : vector<8x96xf32> to vector<8x32xf32>
    %306 = vector.extract_strided_slice %280 {offsets = [0, 96], sizes = [8, 32], strides = [1, 1]} : vector<8x128xf32> to vector<8x32xf32>
    %307 = math.tanh %306 : vector<8x32xf32>
    %308 = arith.mulf %304, %261 : vector<8x32xf32>
    %309 = arith.mulf %303, %307 : vector<8x32xf32>
    %310 = arith.addf %308, %309 : vector<8x32xf32>
    %311 = math.tanh %310 : vector<8x32xf32>
    %312 = arith.mulf %305, %311 : vector<8x32xf32>
    %313 = arith.index_cast %270 : i32 to index
    %c0_92 = arith.constant 0 : index
    %314 = vector.load %arg13[%313, %c0_92] : memref<64x32xf32, #tpu.memory_space<vmem>>, vector<8x32xf32>
    tpu.vector_store %arg13[%313, %c0_92], %296 {strides = array<i32>} : memref<64x32xf32, #tpu.memory_space<vmem>>, vector<8x32xf32>,
    %315 = arith.index_cast %272 : i32 to index
    %c0_93 = arith.constant 0 : index
    %316 = vector.load %arg14[%315, %c0_93] : memref<64x32xf32, #tpu.memory_space<vmem>>, vector<8x32xf32>
    tpu.vector_store %arg14[%315, %c0_93], %312 {strides = array<i32>} : memref<64x32xf32, #tpu.memory_space<vmem>>, vector<8x32xf32>,
    %c6_i32 = arith.constant 6 : i32
    %c7_i32_94 = arith.constant 7 : i32
    %317 = arith.subi %c7_i32_94, %c6_i32 : i32
    %c8_i32_95 = arith.constant 8 : i32
    %318 = arith.muli %c6_i32, %c8_i32_95 : i32
    %319 = tpu.assume_multiple %318, 8 : i32
    %c8_i32_96 = arith.constant 8 : i32
    %320 = arith.muli %317, %c8_i32_96 : i32
    %321 = tpu.assume_multiple %320, 8 : i32
    %322 = arith.index_cast %319 : i32 to index
    %c0_97 = arith.constant 0 : index
    %323 = vector.load %arg23[%322, %c0_97] : memref<64x128xf32, #tpu.memory_space<vmem>>, vector<8x128xf32>
    %cst_98 = arith.constant dense<0.000000e+00> : vector<8x128xf32>
    %324 = tpu.matmul %296, %17, %cst_98 {dimension_numbers = #tpu.dot_dimension_numbers<[1], [0], [0], [1], [0, 0, 1, 1], [], []>} : vector<8x32xf32>, vector<32x128xf32>, vector<8x128xf32> -> vector<8x128xf32>
    %325 = arith.addf %323, %324 : vector<8x128xf32>
    %326 = arith.index_cast %321 : i32 to index
    %c0_99 = arith.constant 0 : index
    %327 = vector.load %arg24[%326, %c0_99] : memref<64x128xf32, #tpu.memory_space<vmem>>, vector<8x128xf32>
    %cst_100 = arith.constant dense<0.000000e+00> : vector<8x128xf32>
    %328 = tpu.matmul %312, %18, %cst_100 {dimension_numbers = #tpu.dot_dimension_numbers<[1], [0], [0], [1], [0, 0, 1, 1], [], []>} : vector<8x32xf32>, vector<32x128xf32>, vector<8x128xf32> -> vector<8x128xf32>
    %329 = arith.addf %327, %328 : vector<8x128xf32>
    %330 = vector.extract_strided_slice %325 {offsets = [0, 0], sizes = [8, 96], strides = [1, 1]} : vector<8x128xf32> to vector<8x96xf32>
    %331 = arith.negf %330 : vector<8x96xf32>
    %332 = math.exp %331 : vector<8x96xf32>
    %cst_101 = arith.constant 1.000000e+00 : f32
    %333 = vector.broadcast %cst_101 : f32 to vector<8x96xf32>
    %334 = arith.addf %333, %332 : vector<8x96xf32>
    %335 = arith.divf %333, %334 : vector<8x96xf32>
    %336 = vector.extract_strided_slice %335 {offsets = [0, 0], sizes = [8, 32], strides = [1, 1]} : vector<8x96xf32> to vector<8x32xf32>
    %337 = vector.extract_strided_slice %335 {offsets = [0, 32], sizes = [8, 32], strides = [1, 1]} : vector<8x96xf32> to vector<8x32xf32>
    %338 = vector.extract_strided_slice %335 {offsets = [0, 64], sizes = [8, 32], strides = [1, 1]} : vector<8x96xf32> to vector<8x32xf32>
    %339 = vector.extract_strided_slice %325 {offsets = [0, 96], sizes = [8, 32], strides = [1, 1]} : vector<8x128xf32> to vector<8x32xf32>
    %340 = math.tanh %339 : vector<8x32xf32>
    %341 = arith.mulf %337, %294 : vector<8x32xf32>
    %342 = arith.mulf %336, %340 : vector<8x32xf32>
    %343 = arith.addf %341, %342 : vector<8x32xf32>
    %344 = math.tanh %343 : vector<8x32xf32>
    %345 = arith.mulf %338, %344 : vector<8x32xf32>
    %346 = vector.extract_strided_slice %329 {offsets = [0, 0], sizes = [8, 96], strides = [1, 1]} : vector<8x128xf32> to vector<8x96xf32>
    %347 = arith.negf %346 : vector<8x96xf32>
    %348 = math.exp %347 : vector<8x96xf32>
    %cst_102 = arith.constant 1.000000e+00 : f32
    %349 = vector.broadcast %cst_102 : f32 to vector<8x96xf32>
    %350 = arith.addf %349, %348 : vector<8x96xf32>
    %351 = arith.divf %349, %350 : vector<8x96xf32>
    %352 = vector.extract_strided_slice %351 {offsets = [0, 0], sizes = [8, 32], strides = [1, 1]} : vector<8x96xf32> to vector<8x32xf32>
    %353 = vector.extract_strided_slice %351 {offsets = [0, 32], sizes = [8, 32], strides = [1, 1]} : vector<8x96xf32> to vector<8x32xf32>
    %354 = vector.extract_strided_slice %351 {offsets = [0, 64], sizes = [8, 32], strides = [1, 1]} : vector<8x96xf32> to vector<8x32xf32>
    %355 = vector.extract_strided_slice %329 {offsets = [0, 96], sizes = [8, 32], strides = [1, 1]} : vector<8x128xf32> to vector<8x32xf32>
    %356 = math.tanh %355 : vector<8x32xf32>
    %357 = arith.mulf %353, %310 : vector<8x32xf32>
    %358 = arith.mulf %352, %356 : vector<8x32xf32>
    %359 = arith.addf %357, %358 : vector<8x32xf32>
    %360 = math.tanh %359 : vector<8x32xf32>
    %361 = arith.mulf %354, %360 : vector<8x32xf32>
    %362 = arith.index_cast %319 : i32 to index
    %c0_103 = arith.constant 0 : index
    %363 = vector.load %arg13[%362, %c0_103] : memref<64x32xf32, #tpu.memory_space<vmem>>, vector<8x32xf32>
    tpu.vector_store %arg13[%362, %c0_103], %345 {strides = array<i32>} : memref<64x32xf32, #tpu.memory_space<vmem>>, vector<8x32xf32>,
    %364 = arith.index_cast %321 : i32 to index
    %c0_104 = arith.constant 0 : index
    %365 = vector.load %arg14[%364, %c0_104] : memref<64x32xf32, #tpu.memory_space<vmem>>, vector<8x32xf32>
    tpu.vector_store %arg14[%364, %c0_104], %361 {strides = array<i32>} : memref<64x32xf32, #tpu.memory_space<vmem>>, vector<8x32xf32>,
    %c7_i32_105 = arith.constant 7 : i32
    %c7_i32_106 = arith.constant 7 : i32
    %366 = arith.subi %c7_i32_106, %c7_i32_105 : i32
    %c8_i32_107 = arith.constant 8 : i32
    %367 = arith.muli %c7_i32_105, %c8_i32_107 : i32
    %368 = tpu.assume_multiple %367, 8 : i32
    %c8_i32_108 = arith.constant 8 : i32
    %369 = arith.muli %366, %c8_i32_108 : i32
    %370 = tpu.assume_multiple %369, 8 : i32
    %371 = arith.index_cast %368 : i32 to index
    %c0_109 = arith.constant 0 : index
    %372 = vector.load %arg23[%371, %c0_109] : memref<64x128xf32, #tpu.memory_space<vmem>>, vector<8x128xf32>
    %cst_110 = arith.constant dense<0.000000e+00> : vector<8x128xf32>
    %373 = tpu.matmul %345, %17, %cst_110 {dimension_numbers = #tpu.dot_dimension_numbers<[1], [0], [0], [1], [0, 0, 1, 1], [], []>} : vector<8x32xf32>, vector<32x128xf32>, vector<8x128xf32> -> vector<8x128xf32>
    %374 = arith.addf %372, %373 : vector<8x128xf32>
    %375 = arith.index_cast %370 : i32 to index
    %c0_111 = arith.constant 0 : index
    %376 = vector.load %arg24[%375, %c0_111] : memref<64x128xf32, #tpu.memory_space<vmem>>, vector<8x128xf32>
    %cst_112 = arith.constant dense<0.000000e+00> : vector<8x128xf32>
    %377 = tpu.matmul %361, %18, %cst_112 {dimension_numbers = #tpu.dot_dimension_numbers<[1], [0], [0], [1], [0, 0, 1, 1], [], []>} : vector<8x32xf32>, vector<32x128xf32>, vector<8x128xf32> -> vector<8x128xf32>
    %378 = arith.addf %376, %377 : vector<8x128xf32>
    %379 = vector.extract_strided_slice %374 {offsets = [0, 0], sizes = [8, 96], strides = [1, 1]} : vector<8x128xf32> to vector<8x96xf32>
    %380 = arith.negf %379 : vector<8x96xf32>
    %381 = math.exp %380 : vector<8x96xf32>
    %cst_113 = arith.constant 1.000000e+00 : f32
    %382 = vector.broadcast %cst_113 : f32 to vector<8x96xf32>
    %383 = arith.addf %382, %381 : vector<8x96xf32>
    %384 = arith.divf %382, %383 : vector<8x96xf32>
    %385 = vector.extract_strided_slice %384 {offsets = [0, 0], sizes = [8, 32], strides = [1, 1]} : vector<8x96xf32> to vector<8x32xf32>
    %386 = vector.extract_strided_slice %384 {offsets = [0, 32], sizes = [8, 32], strides = [1, 1]} : vector<8x96xf32> to vector<8x32xf32>
    %387 = vector.extract_strided_slice %384 {offsets = [0, 64], sizes = [8, 32], strides = [1, 1]} : vector<8x96xf32> to vector<8x32xf32>
    %388 = vector.extract_strided_slice %374 {offsets = [0, 96], sizes = [8, 32], strides = [1, 1]} : vector<8x128xf32> to vector<8x32xf32>
    %389 = math.tanh %388 : vector<8x32xf32>
    %390 = arith.mulf %386, %343 : vector<8x32xf32>
    %391 = arith.mulf %385, %389 : vector<8x32xf32>
    %392 = arith.addf %390, %391 : vector<8x32xf32>
    %393 = math.tanh %392 : vector<8x32xf32>
    %394 = arith.mulf %387, %393 : vector<8x32xf32>
    %395 = vector.extract_strided_slice %378 {offsets = [0, 0], sizes = [8, 96], strides = [1, 1]} : vector<8x128xf32> to vector<8x96xf32>
    %396 = arith.negf %395 : vector<8x96xf32>
    %397 = math.exp %396 : vector<8x96xf32>
    %cst_114 = arith.constant 1.000000e+00 : f32
    %398 = vector.broadcast %cst_114 : f32 to vector<8x96xf32>
    %399 = arith.addf %398, %397 : vector<8x96xf32>
    %400 = arith.divf %398, %399 : vector<8x96xf32>
    %401 = vector.extract_strided_slice %400 {offsets = [0, 0], sizes = [8, 32], strides = [1, 1]} : vector<8x96xf32> to vector<8x32xf32>
    %402 = vector.extract_strided_slice %400 {offsets = [0, 32], sizes = [8, 32], strides = [1, 1]} : vector<8x96xf32> to vector<8x32xf32>
    %403 = vector.extract_strided_slice %400 {offsets = [0, 64], sizes = [8, 32], strides = [1, 1]} : vector<8x96xf32> to vector<8x32xf32>
    %404 = vector.extract_strided_slice %378 {offsets = [0, 96], sizes = [8, 32], strides = [1, 1]} : vector<8x128xf32> to vector<8x32xf32>
    %405 = math.tanh %404 : vector<8x32xf32>
    %406 = arith.mulf %402, %359 : vector<8x32xf32>
    %407 = arith.mulf %401, %405 : vector<8x32xf32>
    %408 = arith.addf %406, %407 : vector<8x32xf32>
    %409 = math.tanh %408 : vector<8x32xf32>
    %410 = arith.mulf %403, %409 : vector<8x32xf32>
    %411 = arith.index_cast %368 : i32 to index
    %c0_115 = arith.constant 0 : index
    %412 = vector.load %arg13[%411, %c0_115] : memref<64x32xf32, #tpu.memory_space<vmem>>, vector<8x32xf32>
    tpu.vector_store %arg13[%411, %c0_115], %394 {strides = array<i32>} : memref<64x32xf32, #tpu.memory_space<vmem>>, vector<8x32xf32>,
    %413 = arith.index_cast %370 : i32 to index
    %c0_116 = arith.constant 0 : index
    %414 = vector.load %arg14[%413, %c0_116] : memref<64x32xf32, #tpu.memory_space<vmem>>, vector<8x32xf32>
    tpu.vector_store %arg14[%413, %c0_116], %410 {strides = array<i32>} : memref<64x32xf32, #tpu.memory_space<vmem>>, vector<8x32xf32>,
    %c8_i32_117 = arith.constant 8 : i32
    %c0_118 = arith.constant 0 : index
    %c0_119 = arith.constant 0 : index
    %415 = vector.load %arg19[%c0_118, %c0_119] : memref<8x32xf32, #tpu.memory_space<vmem>>, vector<8x32xf32>
    tpu.vector_store %arg19[%c0_118, %c0_119], %394 {strides = array<i32>} : memref<8x32xf32, #tpu.memory_space<vmem>>, vector<8x32xf32>,
    %c0_120 = arith.constant 0 : index
    %c0_121 = arith.constant 0 : index
    %416 = vector.load %arg20[%c0_120, %c0_121] : memref<8x32xf32, #tpu.memory_space<vmem>>, vector<8x32xf32>
    tpu.vector_store %arg20[%c0_120, %c0_121], %392 {strides = array<i32>} : memref<8x32xf32, #tpu.memory_space<vmem>>, vector<8x32xf32>,
    %c0_122 = arith.constant 0 : index
    %c0_123 = arith.constant 0 : index
    %417 = vector.load %arg21[%c0_122, %c0_123] : memref<8x32xf32, #tpu.memory_space<vmem>>, vector<8x32xf32>
    tpu.vector_store %arg21[%c0_122, %c0_123], %410 {strides = array<i32>} : memref<8x32xf32, #tpu.memory_space<vmem>>, vector<8x32xf32>,
    %c0_124 = arith.constant 0 : index
    %c0_125 = arith.constant 0 : index
    %418 = vector.load %arg22[%c0_124, %c0_125] : memref<8x32xf32, #tpu.memory_space<vmem>>, vector<8x32xf32>
    tpu.vector_store %arg22[%c0_124, %c0_125], %408 {strides = array<i32>} : memref<8x32xf32, #tpu.memory_space<vmem>>, vector<8x32xf32>,
    %c0_i32_126 = arith.constant 0 : i32
    %419 = arith.cmpi eq, %arg0, %c0_i32_126 : i32
    %420 = arith.extui %419 : i1 to i32
    %c0_i32_127 = arith.constant 0 : i32
    %421 = arith.cmpi ne, %420, %c0_i32_127 : i32
    scf.if %421 {
      %c0_128 = arith.constant 0 : index
      %c0_129 = arith.constant 0 : index
      %422 = vector.load %arg15[%c0_128, %c0_129] : memref<8x32xf32, #tpu.memory_space<vmem>>, vector<8x32xf32>
      tpu.vector_store %arg15[%c0_128, %c0_129], %394 {strides = array<i32>} : memref<8x32xf32, #tpu.memory_space<vmem>>, vector<8x32xf32>,
      %c0_130 = arith.constant 0 : index
      %c0_131 = arith.constant 0 : index
      %423 = vector.load %arg16[%c0_130, %c0_131] : memref<8x32xf32, #tpu.memory_space<vmem>>, vector<8x32xf32>
      tpu.vector_store %arg16[%c0_130, %c0_131], %392 {strides = array<i32>} : memref<8x32xf32, #tpu.memory_space<vmem>>, vector<8x32xf32>,
      %c0_132 = arith.constant 0 : index
      %c0_133 = arith.constant 0 : index
      %424 = vector.load %arg17[%c0_132, %c0_133] : memref<8x32xf32, #tpu.memory_space<vmem>>, vector<8x32xf32>
      tpu.vector_store %arg17[%c0_132, %c0_133], %410 {strides = array<i32>} : memref<8x32xf32, #tpu.memory_space<vmem>>, vector<8x32xf32>,
      %c0_134 = arith.constant 0 : index
      %c0_135 = arith.constant 0 : index
      %425 = vector.load %arg18[%c0_134, %c0_135] : memref<8x32xf32, #tpu.memory_space<vmem>>, vector<8x32xf32>
      tpu.vector_store %arg18[%c0_134, %c0_135], %408 {strides = array<i32>} : memref<8x32xf32, #tpu.memory_space<vmem>>, vector<8x32xf32>,
    } else {
    }
    return
  }
  func.func @transform_0(%arg0: i32) -> (i32, i32) {
    %c0_i32 = arith.constant 0 : i32
    %c0_i32_0 = arith.constant 0 : i32
    return %arg0, %c0_i32 : i32, i32
  }
  func.func @transform_1(%arg0: i32) -> (i32, i32) {
    %c0_i32 = arith.constant 0 : i32
    %0 = arith.subi %c0_i32, %arg0 : i32
    %c0_i32_0 = arith.constant 0 : i32
    %c0_i32_1 = arith.constant 0 : i32
    return %0, %c0_i32_0 : i32, i32
  }
  func.func @transform_2(%arg0: i32) -> (i32, i32) {
    %c0_i32 = arith.constant 0 : i32
    %c0_i32_0 = arith.constant 0 : i32
    %c0_i32_1 = arith.constant 0 : i32
    return %c0_i32, %c0_i32_0 : i32, i32
  }
  func.func @transform_3(%arg0: i32) -> (i32, i32) {
    %c0_i32 = arith.constant 0 : i32
    %c0_i32_0 = arith.constant 0 : i32
    %c0_i32_1 = arith.constant 0 : i32
    return %c0_i32, %c0_i32_0 : i32, i32
  }
  func.func @transform_4(%arg0: i32) -> (i32, i32) {
    %c0_i32 = arith.constant 0 : i32
    %c0_i32_0 = arith.constant 0 : i32
    %c0_i32_1 = arith.constant 0 : i32
    return %c0_i32, %c0_i32_0 : i32, i32
  }
  func.func @transform_5(%arg0: i32) -> (i32, i32) {
    %c0_i32 = arith.constant 0 : i32
    %c0_i32_0 = arith.constant 0 : i32
    %c0_i32_1 = arith.constant 0 : i32
    return %c0_i32, %c0_i32_0 : i32, i32
  }
  func.func @transform_6(%arg0: i32) -> (i32, i32) {
    %c0_i32 = arith.constant 0 : i32
    %c0_i32_0 = arith.constant 0 : i32
    %c0_i32_1 = arith.constant 0 : i32
    return %c0_i32, %c0_i32_0 : i32, i32
  }
  func.func @transform_7(%arg0: i32) -> (i32, i32) {
    %c0_i32 = arith.constant 0 : i32
    %c0_i32_0 = arith.constant 0 : i32
    %c0_i32_1 = arith.constant 0 : i32
    return %c0_i32, %c0_i32_0 : i32, i32
  }
  func.func @transform_8(%arg0: i32) -> (i32, i32) {
    %c0_i32 = arith.constant 0 : i32
    %c0_i32_0 = arith.constant 0 : i32
    %c0_i32_1 = arith.constant 0 : i32
    return %c0_i32, %c0_i32_0 : i32, i32
  }
  func.func @transform_9(%arg0: i32) -> (i32, i32) {
    %c0_i32 = arith.constant 0 : i32
    %c0_i32_0 = arith.constant 0 : i32
    %c0_i32_1 = arith.constant 0 : i32
    return %c0_i32, %c0_i32_0 : i32, i32
  }
  func.func @transform_10(%arg0: i32) -> (i32, i32) {
    %c0_i32 = arith.constant 0 : i32
    %c0_i32_0 = arith.constant 0 : i32
    %c0_i32_1 = arith.constant 0 : i32
    return %c0_i32, %c0_i32_0 : i32, i32
  }
  func.func @transform_11(%arg0: i32) -> (i32, i32) {
    %c0_i32 = arith.constant 0 : i32
    %c0_i32_0 = arith.constant 0 : i32
    %c0_i32_1 = arith.constant 0 : i32
    return %c0_i32, %c0_i32_0 : i32, i32
  }
  func.func @transform_12(%arg0: i32) -> (i32, i32) {
    %c0_i32 = arith.constant 0 : i32
    %c0_i32_0 = arith.constant 0 : i32
    return %arg0, %c0_i32 : i32, i32
  }
  func.func @transform_13(%arg0: i32) -> (i32, i32) {
    %c0_i32 = arith.constant 0 : i32
    %0 = arith.subi %c0_i32, %arg0 : i32
    %c0_i32_0 = arith.constant 0 : i32
    %c0_i32_1 = arith.constant 0 : i32
    return %0, %c0_i32_0 : i32, i32
  }
  func.func @transform_14(%arg0: i32) -> (i32, i32) {
    %c0_i32 = arith.constant 0 : i32
    %c0_i32_0 = arith.constant 0 : i32
    %c0_i32_1 = arith.constant 0 : i32
    return %c0_i32, %c0_i32_0 : i32, i32
  }
  func.func @transform_15(%arg0: i32) -> (i32, i32) {
    %c0_i32 = arith.constant 0 : i32
    %c0_i32_0 = arith.constant 0 : i32
    %c0_i32_1 = arith.constant 0 : i32
    return %c0_i32, %c0_i32_0 : i32, i32
  }
  func.func @transform_16(%arg0: i32) -> (i32, i32) {
    %c0_i32 = arith.constant 0 : i32
    %c0_i32_0 = arith.constant 0 : i32
    %c0_i32_1 = arith.constant 0 : i32
    return %c0_i32, %c0_i32_0 : i32, i32
  }
  func.func @transform_17(%arg0: i32) -> (i32, i32) {
    %c0_i32 = arith.constant 0 : i32
    %c0_i32_0 = arith.constant 0 : i32
    %c0_i32_1 = arith.constant 0 : i32
    return %c0_i32, %c0_i32_0 : i32, i32
  }
}

</mosaic_0001>

<bundles_post_ra>
// kernel: tpu_custom_call.1
= control target key start
LH: loop header
LB: loop body
LE: loop exit
PB: predicated region body
PF: predicated region fallthrough
CT: control target
= control target key end

     0   :  { %s3545_s0 = inlined_call_operand.vmem [shape: f32[64,32], index: 0, kind: input, shape index: {}]   ;;  %s3546_s1 = inlined_call_operand.vmem [shape: f32[64,32], index: 1, kind: input, shape index: {}]   ;;  %s3547_s2 = inlined_call_operand.vmem [shape: f32[32,128], index: 2, kind: input, shape index: {}]   ;;  %s3548_s3 = inlined_call_operand.vmem [shape: f32[32,128], index: 3, kind: input, shape index: {}]   ;;  %s3549_s4 = inlined_call_operand.vmem [shape: f32[32,128], index: 4, kind: input, shape index: {}]   ;;  %s3550_s5 = inlined_call_operand.vmem [shape: f32[32,128], index: 5, kind: input, shape index: {}]   ;;  %s3551_s6 = inlined_call_operand.vmem [shape: f32[1,128], index: 6, kind: input, shape index: {}]   ;;  %s3552_s7 = inlined_call_operand.vmem [shape: f32[1,128], index: 7, kind: input, shape index: {}]   ;;  %s3553_s8 = inlined_call_operand.vmem [shape: f32[8,32], index: 8, kind: input, shape index: {}]   ;;  %s3554_s9 = inlined_call_operand.vmem [shape: f32[8,32], index: 9, kind: input, shape index: {}]   ;;  %s3555_s10 = inlined_call_operand.vmem [shape: f32[8,32], index: 10, kind: input, shape index: {}]   ;;  %s3556_s11 = inlined_call_operand.vmem [shape: f32[8,32], index: 11, kind: input, shape index: {}]   ;;  %s3557_s12 = inlined_call_operand.vmem [shape: f32[64,32], index: 12, kind: output, shape index: {0}]   ;;  %s3558_s13 = inlined_call_operand.vmem [shape: f32[64,32], index: 13, kind: output, shape index: {1}]   ;;  %s3559_s14 = inlined_call_operand.hbm [shape: f32[8,32], index: 14, kind: output, shape index: {2}]   ;;  %s3560_s15 = inlined_call_operand.hbm [shape: f32[8,32], index: 15, kind: output, shape index: {3}]   ;;  %s3561_s16 = inlined_call_operand.hbm [shape: f32[8,32], index: 16, kind: output, shape index: {4}]   ;;  %s3562_s17 = inlined_call_operand.hbm [shape: f32[8,32], index: 17, kind: output, shape index: {5}]  }
   0x1   :  { %3565 = sst [smem:[#allocation18_spill]] %s3545_s0 }
   0x2   :  { %3566 = sst [smem:[#allocation19_spill]] %s3546_s1 }
   0x3   :  { %23 = vsyncpa [#allocation9], 0 }
   0x4   :  { %24 = vsyncpa [#allocation11], 0  ;;  %v107_v0 = vld [vmem:[%s3547_s2] sm:$0xff]  ;;  %v108_v1 = vld [vmem:[%s3547_s2 + $0x8] sm:$0xff]  ;;  %vm91_vm0 = vcmask 261120   ;;  %s3567_s23 = sld [smem:[#allocation18_spill]] }
   0x5   :  { %v264_v2 = vld [vmem:[%s3548_s3] sm:$0xff]  ;;  %v2604_v3 = vpack.c.bf16 %v108_v1, %v107_v0  ;;  %v265_v4 = vld [vmem:[%s3548_s3 + $0x8] sm:$0xff]  ;;  %v109_v5 = vld [vmem:[%s3547_s2 + $0x10] sm:$0xff]  ;;  %s3568_s29 = sld [smem:[#allocation19_spill]]  ;;  %v2948_v22 = vmov 0.0|0.0  }
   0x6   :  { %v110_v6 = vld [vmem:[%s3547_s2 + $0x18] sm:$0xff]  ;;  %v2612_v7 = vpack.c.bf16 %v265_v4, %v264_v2  ;;  %v266_v10 = vld [vmem:[%s3548_s3 + $0x10] sm:$0xff]  ;;  %v412_v14 = vld [vmem:[%s3549_s4] sm:$0xff] }
   0x7   :  { %v2608_v8 = vpack.c.bf16 %v110_v6, %v109_v5  ;;  %v267_v11 = vld [vmem:[%s3548_s3 + $0x18] sm:$0xff]  ;;  %2605 = vmatprep.subr.bf16.mxu0 %v2604_v3  ;;  %v413_v15 = vld [vmem:[%s3549_s4 + $0x8] sm:$0xff]  ;;  %v416_v16 = vld [vmem:[%s3550_s5] sm:$0xff] }
   0x8   :  { %v2616_v12 = vpack.c.bf16 %v267_v11, %v266_v10  ;;  %2607 = vmatpush3.bf16.msra.mxu0 %v2604_v3  ;;  %2613 = vmatprep.subr.bf16.mxu1 %v2612_v7  ;;  %v417_v17 = vld [vmem:[%s3550_s5 + $0x8] sm:$0xff]  ;;  %v3095_v19 = vpack.c.bf16 %v413_v15, %v412_v14  ;;  %v414_v24 = vld [vmem:[%s3549_s4 + $0x10] sm:$0xff]  ;;  %v415_v25 = vld [vmem:[%s3549_s4 + $0x18] sm:$0xff] }
   0x9   :  { %2609 = vmatprep.subr.bf16.mxu0 %v2608_v8  ;;  %2615 = vmatpush3.bf16.msra.mxu1 %v2612_v7  ;;  %v3114_v26 = vpack.c.bf16 %v417_v17, %v416_v16  ;;  %v418_v27 = vld [vmem:[%s3550_s5 + $0x10] sm:$0xff]  ;;  %v419_v28 = vld [vmem:[%s3550_s5 + $0x18] sm:$0xff]  ;;  %v90_v29 = vld [vmem:[%s3553_s8] sm:$0xff]  ;;  %v3141_v34 = vpack.c.bf16 %v415_v25, %v414_v24 }
   0xa   :  { %v99_v9 = vld [vmem:[%s3567_s23] sm:$0xff]  ;;  %2617 = vmatprep.subr.bf16.mxu1 %v2616_v12  ;;  %v100_v18 = vld [vmem:[%s3567_s23 + $0x8] sm:$0xff]  ;;  %v101_v20 = vld [vmem:[%s3567_s23 + $0x10] sm:$0xff]  ;;  %92 = vst.msk [vmem:[#allocation2] sm:$0xff] %vm91_vm0, %v90_v29 }
   0xb   :  { %2396 = vmatprep.mubr.msk.f32.mxu0 %vm91_vm0, %v99_v9  ;;  %v256_v13 = vld [vmem:[%s3568_s29] sm:$0xff]  ;;  %v257_v21 = vld [vmem:[%s3568_s29 + $0x8] sm:$0xff]  ;;  %v258_v23 = vld [vmem:[%s3568_s29 + $0x10] sm:$0xff] }
   0xc   :  { %2416 = vmatprep.mubr.msk.f32.mxu1 %vm91_vm0, %v256_v13  ;;  %2611 = vmatpush3.bf16.msra.mxu0 %v2608_v8  ;;  %v95_v30 = vld [vmem:[%s3555_s10] sm:$0xff]  ;;  %v102_v33 = vld [vmem:[%s3567_s23 + $0x18] sm:$0xff] }
   0xd   :  { %2619 = vmatpush3.bf16.msra.mxu1 %v2616_v12  ;;  %2620 = vmatprep.subr.bf16.mxu0 %v2948_v22  ;;  %v93_v31 = vld [vmem:[%s3554_s9] sm:$0xff]  ;;  %96 = vst.msk [vmem:[#allocation4] sm:$0xff] %vm91_vm0, %v95_v30 }
   0xe   :  { %2626 = vmatprep.subr.bf16.mxu1 %v2948_v22  ;;  %v97_v32 = vld [vmem:[%s3556_s11] sm:$0xff]  ;;  %94 = vst.msk [vmem:[#allocation3] sm:$0xff] %vm91_vm0, %v93_v31 }
   0xf   :  { %2397 = vmatmul.mubr.msk.f32.vlgmr.msra.gmra.mrb[0].mxu0 %vm91_vm0, %v100_v18  ;;  %98 = vst.msk [vmem:[#allocation5] sm:$0xff] %vm91_vm0, %v97_v32 }
  0x10   :  { %2622 = vmatpush3.bf16.msra.mxu0 %v3095_v19  ;;  %2399 = vmatprep.mubr.msk.f32.mxu0 %vm91_vm0, %v101_v20 }
  0x11   :  { %25 = vsyncpa [#allocation14], 0  ;;  %2417 = vmatmul.mubr.msk.f32.vlgmr.msra.gmra.mrb[0].mxu1 %vm91_vm0, %v257_v21  ;;  %v103_v35 = vld [vmem:[%s3567_s23 + $0x20] sm:$0xff]  ;;  %2623 = vmatprep.subr.bf16.mxu0 %v2948_v22  ;;  %v259_v36 = vld [vmem:[%s3568_s29 + $0x18] sm:$0xff]  ;;  %v3156_v37 = vpack.c.bf16 %v419_v28, %v418_v27  ;;  %s2949_s2 = smov 32   ;;  %vm2950_vm1 = vmmov 0  }
  0x12   :  { %2628 = vmatpush3.bf16.msra.mxu1 %v3114_v26  ;;  %2419 = vmatprep.mubr.msk.f32.mxu1 %vm91_vm0, %v258_v23  ;;  %v260_v38 = vld [vmem:[%s3568_s29 + $0x20] sm:$0xff]  ;;  %v104_v39 = vld [vmem:[%s3567_s23 + $0x28] sm:$0xff]  ;;  %v105_v40 = vld [vmem:[%s3567_s23 + $0x30] sm:$0xff]  ;;  %v2951_v47 = vmov 0.0   ;;  %s2953_s18 = smov 96   ;;  %s2954_s19 = smov [#allocation10]  }
  0x13   :  { %2400 = vmatmul.mubr.msk.f32.gmra.mrb[2].mxu0 %vm91_vm0, %v102_v33  ;;  %2629 = vmatprep.subr.bf16.mxu1 %v2948_v22  ;;  %v261_v41 = vld [vmem:[%s3568_s29 + $0x28] sm:$0xff]  ;;  %v262_v42 = vld [vmem:[%s3568_s29 + $0x30] sm:$0xff]  ;;  %v106_v44 = vld [vmem:[%s3567_s23 + $0x38] sm:$0xff]  ;;  %s2157_s3 = sshll.u32 %s2954_s19, 4  ;;  %s2158_s3 = int_to_ptr.vmem [resolvable:$true] %s2157_s3 }
  0x14   :  { %2402 = vmatprep.mubr.msk.f32.mxu0 %vm91_vm0, %v103_v35  ;;  %2625 = vmatpush3.bf16.msra.mxu0 %v3141_v34  ;;  %v263_v46 = vld [vmem:[%s3568_s29 + $0x38] sm:$0xff]  ;;  %v420_v48 = vld [vmem:[#allocation2] sm:$0xff]  ;;  %v422_v49 = vld [vmem:[#allocation4] sm:$0xff]  ;;  %s2854_s1 = scalar_lea.vmem %s2158_s3, 128  ;;  %p2859_p1 = scmp.lt.s32.totalorder %s2158_s3, %s2158_s3 }
  0x15   :  { %2420 = vmatmul.mubr.msk.f32.gmra.mrb[2].mxu1 %vm91_vm0, %v259_v36  ;;  %2632 = vmatprep.subr.bf16.mxu0 %v2948_v22  ;;  %v421_v43 = vld [vmem:[#allocation3] sm:$0xff]  ;;  %v2220_v50 = vld [vmem:[%s3551_s6] ss:$0 sm:$0xff]  ;;  %s2952_s6 = smov 64   ;;  %p2855_p0 = scmp.ne.s32.totalorder %s2158_s3, %s2854_s1 }
  0x16   :  { %2422 = vmatprep.mubr.msk.f32.mxu1 %vm91_vm0, %v260_v38  ;;  %2631 = vmatpush3.bf16.msra.mxu1 %v3156_v37  ;;  %v423_v45 = vld [vmem:[#allocation5] sm:$0xff]  ;;  %v2229_v52 = vld [vmem:[%s3552_s7] ss:$0 sm:$0xff]  ;;  %p2860_p2 = scmp.lt.s32.totalorder %s2854_s1, %s2854_s1 }
  0x17   :  { %2403 = vmatmul.mubr.msk.f32.gmra.mrb[4].mxu0 %vm91_vm0, %v104_v39  ;;  %2638 = vmatprep.subr.bf16.mxu1 %v2948_v22 }
  0x18   :  { %2405 = vmatprep.mubr.msk.f32.mxu0 %vm91_vm0, %v105_v40  ;;  %583 = vrot.lane.b32.xlu1 %v421_v43, %s2949_s2  ;;  %p2861_p3 = por %p2860_p2, %p2859_p1 }
  0x19   :  { %2423 = vmatmul.mubr.msk.f32.gmra.mrb[4].mxu1 %vm91_vm0, %v261_v41 }
  0x1a   :  { %2425 = vmatprep.mubr.msk.f32.mxu1 %vm91_vm0, %v262_v42  ;;  %p2862_p4 = pnand %p2861_p3, %p2855_p0 }
  0x1b   :  { %2406 = vmatmul.mubr.msk.f32.gmra.mrb[6].mxu0 %vm91_vm0, %v106_v44 }
  0x1c   :  { %2436 = vmatprep.mubr.msk.f32.mxu0 %vm2950_vm1, %v2951_v47  ;;  %611 = vrot.lane.b32.xlu1 %v423_v45, %s2949_s2 }
  0x1d   :  { %2426 = vmatmul.mubr.msk.f32.gmra.mrb[6].mxu1 %vm91_vm0, %v263_v46 }
  0x1e   :  { %2447 = vmatprep.mubr.msk.f32.mxu1 %vm2950_vm1, %v2951_v47 }
  0x1f   :  { %2437 = vmatmul.mubr.msk.f32.vlgmr.msra.gmra.mrb[8].mxu0 %vm91_vm0, %v420_v48 }
  0x20   :  { %2634 = vmatpush3.bf16.msra.mxu0 %v3095_v19  ;;  %2458 = vmatprep.mubr.msk.f32.mxu0 %vm2950_vm1, %v2951_v47 }
  0x21   :  { %2448 = vmatmul.mubr.msk.f32.vlgmr.msra.gmra.mrb[8].mxu1 %vm91_vm0, %v422_v49  ;;  %2635 = vmatprep.subr.bf16.mxu0 %v2948_v22 }
  0x22   :  { %2640 = vmatpush3.bf16.msra.mxu1 %v3114_v26  ;;  %2469 = vmatprep.mubr.msk.f32.mxu1 %vm2950_vm1, %v2951_v47 }
  0x23   :  { %2641 = vmatprep.subr.bf16.mxu1 %v2948_v22 }
  0x24   :  { %2637 = vmatpush3.bf16.msra.mxu0 %v3141_v34 }
  0x25   :  { %2644 = vmatprep.subr.bf16.mxu0 %v2948_v22 }
  0x26   :  { %2643 = vmatpush3.bf16.msra.mxu1 %v3156_v37 }
  0x27   :  { %2650 = vmatprep.subr.bf16.mxu1 %v2948_v22 }
  0x8a   :  { %v584_v45 = vpop.permute.xlu1 %583 }
  0x8e   :  { %v612_v48 = vpop.permute.xlu1 %611 }
  0xe2   :  { %v2398_v51 = vpop.f32.mrb[0].mxu0 }
  0xe3   :  { %v3220_v53 = vadd.f32 %v2398_v51, %v2220_v50  ;;  %v209_v54 = vpop.f32.mrb[1].mxu0 }
  0xe4   :  { %v2418_v55 = vpop.f32.mrb[0].mxu1  ;;  %v210_v16 = vadd.f32 %v2220_v50, %v209_v54 }
  0xe5   :  { %v3222_v56 = vadd.f32 %v2418_v55, %v2229_v52  ;;  %v365_v57 = vpop.f32.mrb[1].mxu1 }
  0xe6   :  { %v2401_v58 = vpop.f32.mrb[2].mxu0  ;;  %v3224_v59 = vadd.f32 %v2229_v52, %v365_v57 }
  0xe7   :  { %v3226_v60 = vadd.f32 %v2401_v58, %v2220_v50  ;;  %v219_v61 = vpop.f32.mrb[3].mxu0 }
  0xe8   :  { %v3228_v62 = vadd.f32 %v2220_v50, %v219_v61  ;;  %v2421_v63 = vpop.f32.mrb[2].mxu1 }
  0xe9   :  { %v3230_v0 = vadd.f32 %v2421_v63, %v2229_v52  ;;  %v375_v1 = vpop.f32.mrb[3].mxu1 }
  0xea   :  { %v2404_v2 = vpop.f32.mrb[4].mxu0  ;;  %v3232_v3 = vadd.f32 %v2229_v52, %v375_v1 }
  0xeb   :  { %v3234_v4 = vadd.f32 %v2404_v2, %v2220_v50  ;;  %v229_v5 = vpop.f32.mrb[5].mxu0 }
  0xec   :  { %v3236_v6 = vadd.f32 %v2220_v50, %v229_v5  ;;  %v2424_v7 = vpop.f32.mrb[4].mxu1 }
  0xed   :  { %v3238_v8 = vadd.f32 %v2424_v7, %v2229_v52  ;;  %v385_v9 = vpop.f32.mrb[5].mxu1 }
  0xee   :  { %v2407_v10 = vpop.f32.mrb[6].mxu0  ;;  %v3240_v11 = vadd.f32 %v2229_v52, %v385_v9 }
  0xef   :  { %v3242_v12 = vadd.f32 %v2407_v10, %v2220_v50  ;;  %v239_v13 = vpop.f32.mrb[7].mxu0 }
  0xf0   :  { %v3244_v14 = vadd.f32 %v2220_v50, %v239_v13  ;;  %v2427_v15 = vpop.f32.mrb[6].mxu1 }
  0xf1   :  { %v401_v17 = vadd.f32 %v2427_v15, %v2229_v52  ;;  %v395_v18 = vpop.f32.mrb[7].mxu1 }
  0xf2   :  { %v494_v20 = vpop.f32.mrb[8].mxu0  ;;  %v3246_v21 = vadd.f32 %v2229_v52, %v395_v18 }
  0xf3   :  { %v498_v23 = vadd.f32 %v494_v20, %v210_v16  ;;  %v2438_v24 = vpop.f32.mrb[9].mxu0 }
  0xf4   :  { %v570_v25 = vpop.f32.mrb[8].mxu1 }
  0xf5   :  { %2726 = vtanh.f32 %v498_v23  ;;  %v574_v27 = vadd.f32 %v570_v25, %v401_v17  ;;  %v2449_v28 = vpop.f32.mrb[9].mxu1  ;;  %v2240_v31 = vmul.f32 -1.442695, %v498_v23 }
  0xf7   :  { %2728 = vtanh.f32 %v574_v27  ;;  %v2241_v32 = vmul.f32 -1.442695, %v574_v27 }
  0xf8   :  { %2730 = vpow2.f32 %v2240_v31 }
  0xf9   :  { %2732 = vpow2.f32 %v2241_v32 }
  0xff   :  { %v2727_v29 = vpop.eup %2726 }
 0x100   :  { %588 = vrot.lane.b32.xlu0 %v2727_v29, %s2949_s2 }
 0x101   :  { %v2729_v30 = vpop.eup %2728 }
 0x102   :  { %v2731_v33 = vpop.eup %2730 }
 0x103   :  { %v578_v35 = vadd.f32 1.0, %v2731_v33  ;;  %v2733_v36 = vpop.eup %2732 }
 0x104   :  { %616 = vrot.lane.b32.xlu0 %v2729_v30, %s2949_s2  ;;  %v606_v38 = vadd.f32 1.0, %v2733_v36 }
 0x105   :  { %2734 = vrcp.f32 %v578_v35 }
 0x106   :  { %2736 = vrcp.f32 %v606_v38 }
 0x10f   :  { %v2735_v39 = vpop.eup %2734 }
 0x110   :  { %v2737_v42 = vpop.eup %2736  ;;  %v586_v46 = vmul.f32 %v2735_v39, %v584_v45 }
 0x111   :  { %v614_v51 = vmul.f32 %v2737_v42, %v612_v48 }
 0x172   :  { %v589_v40 = vpop.permute.xlu0 %588 }
 0x173   :  { %v591_v41 = vmul.f32 %v2735_v39, %v589_v40 }
 0x175   :  { %593 = vrot.lane.b32.xlu0 %v591_v41, %s2949_s2 }
 0x176   :  { %v617_v43 = vpop.permute.xlu0 %616 }
 0x177   :  { %v619_v44 = vmul.f32 %v2737_v42, %v617_v43 }
 0x179   :  { %621 = vrot.lane.b32.xlu1 %v619_v44, %s2949_s2 }
 0x1e7   :  { %v594_v49 = vpop.permute.xlu0 %593 }
 0x1e8   :  { %v3252_v50 = vadd.f32 %v594_v49, %v586_v46 }
 0x1ea   :  { %2738 = vtanh.f32 %v3252_v50 }
 0x1eb   :  { %v622_v52 = vpop.permute.xlu1 %621 }
 0x1ec   :  { %v3255_v54 = vadd.f32 %v622_v52, %v614_v51 }
 0x1ee   :  { %2740 = vtanh.f32 %v3255_v54 }
 0x1f4   :  { %v2739_v55 = vpop.eup %2738 }
 0x1f5   :  { %599 = vrot.lane.b32.xlu0 %v2739_v55, %s2949_s2 }
 0x1f8   :  { %v2741_v57 = vpop.eup %2740 }
 0x1f9   :  { %627 = vrot.lane.b32.xlu1 %v2741_v57, %s2949_s2 }
 0x267   :  { %v600_v58 = vpop.permute.xlu0 %599 }
 0x268   :  { %v602_v61 = vmul.f32 %v2735_v39, %v600_v58 }
 0x26a   :  { %632 = vrot.lane.b32.xlu0 %v602_v61, %s2952_s6 }
 0x26b   :  { %v628_v63 = vpop.permute.xlu1 %627 }
 0x26c   :  { %v630_v1 = vmul.f32 %v2737_v42, %v628_v63 }
 0x26e   :  { %637 = vrot.lane.b32.xlu1 %v630_v1, %s2952_s6 }
 0x2dc   :  { %v633_v2 = vpop.permute.xlu0 %632 }
 0x2dd   :  { %635 = vst.msk [vmem:[%s3557_s12] sm:$0xff] %vm91_vm0, %v633_v2  ;;  %2459 = vmatmul.mubr.msk.f32.vlgmr.msra.gmra.mrb[10].mxu0 %vm91_vm0, %v633_v2 }
 0x2de   :  { %2646 = vmatpush3.bf16.msra.mxu0 %v3095_v19  ;;  %2480 = vmatprep.mubr.msk.f32.mxu0 %vm2950_vm1, %v2951_v47 }
 0x2df   :  { %2647 = vmatprep.subr.bf16.mxu0 %v2948_v22 }
 0x2e0   :  { %v638_v5 = vpop.permute.xlu1 %637 }
 0x2e1   :  { %2242 = vst.msk [vmem:[%s3558_s13 + $0x38] sm:$0xff] %vm91_vm0, %v638_v5  ;;  %2470 = vmatmul.mubr.msk.f32.vlgmr.msra.gmra.mrb[10].mxu1 %vm91_vm0, %v638_v5 }
 0x2e2   :  { %2649 = vmatpush3.bf16.msra.mxu0 %v3141_v34  ;;  %2652 = vmatpush3.bf16.msra.mxu1 %v3114_v26 }
 0x2e3   :  { %2653 = vmatprep.subr.bf16.mxu1 %v2948_v22  ;;  %2491 = vmatprep.mubr.msk.f32.mxu1 %vm2950_vm1, %v2951_v47 }
 0x2e4   :  { %2656 = vmatprep.subr.bf16.mxu0 %v2948_v22 }
 0x2e6   :  { %2655 = vmatpush3.bf16.msra.mxu1 %v3156_v37 }
 0x2e7   :  { %2662 = vmatprep.subr.bf16.mxu1 %v2948_v22 }
 0x3b0   :  { %v712_v7 = vpop.f32.mrb[10].mxu0 }
 0x3b1   :  { %v716_v9 = vadd.f32 %v712_v7, %v3220_v53  ;;  %v2460_v10 = vpop.f32.mrb[11].mxu0 }
 0x3b3   :  { %2742 = vtanh.f32 %v716_v9  ;;  %v2245_v20 = vmul.f32 -1.442695, %v716_v9 }
 0x3b4   :  { %v787_v13 = vpop.f32.mrb[10].mxu1 }
 0x3b5   :  { %v791_v15 = vadd.f32 %v787_v13, %v3246_v21  ;;  %v2471_v16 = vpop.f32.mrb[11].mxu1 }
 0x3b7   :  { %2744 = vtanh.f32 %v791_v15  ;;  %v2246_v23 = vmul.f32 -1.442695, %v791_v15 }
 0x3b8   :  { %2746 = vpow2.f32 %v2245_v20 }
 0x3b9   :  { %2748 = vpow2.f32 %v2246_v23 }
 0x3bd   :  { %v2743_v17 = vpop.eup %2742 }
 0x3be   :  { %801 = vrot.lane.b32.xlu0 %v2743_v17, %s2949_s2 }
 0x3c1   :  { %v2745_v18 = vpop.eup %2744 }
 0x3c2   :  { %825 = vrot.lane.b32.xlu1 %v2745_v18, %s2949_s2  ;;  %v2747_v24 = vpop.eup %2746 }
 0x3c3   :  { %v795_v25 = vadd.f32 1.0, %v2747_v24  ;;  %v2749_v53 = vpop.eup %2748 }
 0x3c4   :  { %v819_v27 = vadd.f32 1.0, %v2749_v53 }
 0x3c5   :  { %2750 = vrcp.f32 %v795_v25 }
 0x3c6   :  { %2752 = vrcp.f32 %v819_v27 }
 0x3cf   :  { %v2751_v28 = vpop.eup %2750 }
 0x3d0   :  { %v2753_v30 = vpop.eup %2752  ;;  %v799_v33 = vmul.f32 %v2751_v28, %v3252_v50 }
 0x3d1   :  { %v823_v38 = vmul.f32 %v2753_v30, %v3255_v54 }
 0x430   :  { %v802_v21 = vpop.permute.xlu0 %801 }
 0x431   :  { %v804_v29 = vmul.f32 %v2751_v28, %v802_v21 }
 0x433   :  { %806 = vrot.lane.b32.xlu0 %v804_v29, %s2949_s2 }
 0x434   :  { %v826_v31 = vpop.permute.xlu1 %825 }
 0x435   :  { %v828_v32 = vmul.f32 %v2753_v30, %v826_v31 }
 0x437   :  { %830 = vrot.lane.b32.xlu1 %v828_v32, %s2949_s2 }
 0x4a5   :  { %v807_v35 = vpop.permute.xlu0 %806 }
 0x4a6   :  { %v809_v36 = vadd.f32 %v807_v35, %v799_v33 }
 0x4a8   :  { %2754 = vtanh.f32 %v809_v36 }
 0x4a9   :  { %v831_v39 = vpop.permute.xlu1 %830 }
 0x4aa   :  { %v833_v40 = vadd.f32 %v831_v39, %v823_v38 }
 0x4ac   :  { %2756 = vtanh.f32 %v833_v40 }
 0x4b2   :  { %v2755_v41 = vpop.eup %2754 }
 0x4b3   :  { %812 = vrot.lane.b32.xlu0 %v2755_v41, %s2949_s2 }
 0x4b6   :  { %v2757_v42 = vpop.eup %2756 }
 0x4b7   :  { %836 = vrot.lane.b32.xlu1 %v2757_v42, %s2949_s2 }
 0x525   :  { %v813_v43 = vpop.permute.xlu0 %812 }
 0x526   :  { %v815_v44 = vmul.f32 %v2751_v28, %v813_v43 }
 0x528   :  { %841 = vrot.lane.b32.xlu0 %v815_v44, %s2952_s6 }
 0x529   :  { %v837_v45 = vpop.permute.xlu1 %836 }
 0x52a   :  { %v839_v46 = vmul.f32 %v2753_v30, %v837_v45 }
 0x52c   :  { %847 = vrot.lane.b32.xlu1 %v839_v46, %s2952_s6 }
 0x59a   :  { %v842_v48 = vpop.permute.xlu0 %841 }
 0x59b   :  { %2247 = vst.msk [vmem:[%s3557_s12 + $0x8] sm:$0xff] %vm91_vm0, %v842_v48  ;;  %2481 = vmatmul.mubr.msk.f32.vlgmr.msra.gmra.mrb[12].mxu0 %vm91_vm0, %v842_v48 }
 0x59c   :  { %2658 = vmatpush3.bf16.msra.mxu0 %v3095_v19  ;;  %2502 = vmatprep.mubr.msk.f32.mxu0 %vm2950_vm1, %v2951_v47 }
 0x59d   :  { %2659 = vmatprep.subr.bf16.mxu0 %v2948_v22 }
 0x59e   :  { %v848_v49 = vpop.permute.xlu1 %847 }
 0x59f   :  { %2248 = vst.msk [vmem:[%s3558_s13 + $0x30] sm:$0xff] %vm91_vm0, %v848_v49  ;;  %2492 = vmatmul.mubr.msk.f32.vlgmr.msra.gmra.mrb[12].mxu1 %vm91_vm0, %v848_v49 }
 0x5a0   :  { %2661 = vmatpush3.bf16.msra.mxu0 %v3141_v34  ;;  %2664 = vmatpush3.bf16.msra.mxu1 %v3114_v26 }
 0x5a1   :  { %2665 = vmatprep.subr.bf16.mxu1 %v2948_v22  ;;  %2513 = vmatprep.mubr.msk.f32.mxu1 %vm2950_vm1, %v2951_v47 }
 0x5a2   :  { %2668 = vmatprep.subr.bf16.mxu0 %v2948_v22 }
 0x5a4   :  { %2667 = vmatpush3.bf16.msra.mxu1 %v3156_v37 }
 0x5a5   :  { %2674 = vmatprep.subr.bf16.mxu1 %v2948_v22 }
 0x66e   :  { %v922_v50 = vpop.f32.mrb[12].mxu0 }
 0x66f   :  { %v926_v51 = vadd.f32 %v922_v50, %v3228_v62  ;;  %v2482_v52 = vpop.f32.mrb[13].mxu0 }
 0x671   :  { %2758 = vtanh.f32 %v926_v51  ;;  %v2251_v63 = vmul.f32 -1.442695, %v926_v51 }
 0x672   :  { %v997_v54 = vpop.f32.mrb[12].mxu1 }
 0x673   :  { %v1001_v55 = vadd.f32 %v997_v54, %v3238_v8  ;;  %v2493_v57 = vpop.f32.mrb[13].mxu1 }
 0x675   :  { %2760 = vtanh.f32 %v1001_v55  ;;  %v2252_v1 = vmul.f32 -1.442695, %v1001_v55 }
 0x676   :  { %2762 = vpow2.f32 %v2251_v63 }
 0x677   :  { %2764 = vpow2.f32 %v2252_v1 }
 0x67b   :  { %v2759_v58 = vpop.eup %2758 }
 0x67c   :  { %1011 = vrot.lane.b32.xlu0 %v2759_v58, %s2949_s2 }
 0x67f   :  { %v2761_v61 = vpop.eup %2760 }
 0x680   :  { %1035 = vrot.lane.b32.xlu1 %v2761_v61, %s2949_s2  ;;  %v2763_v2 = vpop.eup %2762 }
 0x681   :  { %v1005_v5 = vadd.f32 1.0, %v2763_v2  ;;  %v2765_v62 = vpop.eup %2764 }
 0x682   :  { %v1029_v7 = vadd.f32 1.0, %v2765_v62 }
 0x683   :  { %2766 = vrcp.f32 %v1005_v5 }
 0x684   :  { %2768 = vrcp.f32 %v1029_v7 }
 0x68d   :  { %v2767_v9 = vpop.eup %2766 }
 0x68e   :  { %v2769_v13 = vpop.eup %2768  ;;  %v1009_v17 = vmul.f32 %v2767_v9, %v809_v36 }
 0x68f   :  { %v1033_v23 = vmul.f32 %v2769_v13, %v833_v40 }
 0x6ee   :  { %v1012_v8 = vpop.permute.xlu0 %1011 }
 0x6ef   :  { %v1014_v10 = vmul.f32 %v2767_v9, %v1012_v8 }
 0x6f1   :  { %1016 = vrot.lane.b32.xlu0 %v1014_v10, %s2949_s2 }
 0x6f2   :  { %v1036_v15 = vpop.permute.xlu1 %1035 }
 0x6f3   :  { %v1038_v16 = vmul.f32 %v2769_v13, %v1036_v15 }
 0x6f5   :  { %1040 = vrot.lane.b32.xlu1 %v1038_v16, %s2949_s2 }
 0x763   :  { %v1017_v18 = vpop.permute.xlu0 %1016 }
 0x764   :  { %v1019_v20 = vadd.f32 %v1017_v18, %v1009_v17 }
 0x766   :  { %2770 = vtanh.f32 %v1019_v20 }
 0x767   :  { %v1041_v24 = vpop.permute.xlu1 %1040 }
 0x768   :  { %v1043_v25 = vadd.f32 %v1041_v24, %v1033_v23 }
 0x76a   :  { %2772 = vtanh.f32 %v1043_v25 }
 0x770   :  { %v2771_v53 = vpop.eup %2770 }
 0x771   :  { %1022 = vrot.lane.b32.xlu0 %v2771_v53, %s2949_s2 }
 0x774   :  { %v2773_v27 = vpop.eup %2772 }
 0x775   :  { %1046 = vrot.lane.b32.xlu1 %v2773_v27, %s2949_s2 }
 0x7e3   :  { %v1023_v28 = vpop.permute.xlu0 %1022 }
 0x7e4   :  { %v1025_v21 = vmul.f32 %v2767_v9, %v1023_v28 }
 0x7e6   :  { %1051 = vrot.lane.b32.xlu0 %v1025_v21, %s2952_s6 }
 0x7e7   :  { %v1047_v29 = vpop.permute.xlu1 %1046 }
 0x7e8   :  { %v1049_v30 = vmul.f32 %v2769_v13, %v1047_v29 }
 0x7ea   :  { %1057 = vrot.lane.b32.xlu1 %v1049_v30, %s2952_s6 }
 0x858   :  { %v1052_v31 = vpop.permute.xlu0 %1051 }
 0x859   :  { %2253 = vst.msk [vmem:[%s3557_s12 + $0x10] sm:$0xff] %vm91_vm0, %v1052_v31  ;;  %2503 = vmatmul.mubr.msk.f32.vlgmr.msra.gmra.mrb[14].mxu0 %vm91_vm0, %v1052_v31 }
 0x85a   :  { %2670 = vmatpush3.bf16.msra.mxu0 %v3095_v19  ;;  %2524 = vmatprep.mubr.msk.f32.mxu0 %vm2950_vm1, %v2951_v47 }
 0x85b   :  { %2671 = vmatprep.subr.bf16.mxu0 %v2948_v22 }
 0x85c   :  { %v1058_v32 = vpop.permute.xlu1 %1057 }
 0x85d   :  { %2254 = vst.msk [vmem:[%s3558_s13 + $0x28] sm:$0xff] %vm91_vm0, %v1058_v32  ;;  %2514 = vmatmul.mubr.msk.f32.vlgmr.msra.gmra.mrb[14].mxu1 %vm91_vm0, %v1058_v32 }
 0x85e   :  { %2673 = vmatpush3.bf16.msra.mxu0 %v3141_v34  ;;  %2676 = vmatpush3.bf16.msra.mxu1 %v3114_v26 }
 0x85f   :  { %2677 = vmatprep.subr.bf16.mxu1 %v2948_v22  ;;  %2535 = vmatprep.mubr.msk.f32.mxu1 %vm2950_vm1, %v2951_v47 }
 0x860   :  { %2680 = vmatprep.subr.bf16.mxu0 %v2948_v22 }
 0x862   :  { %2679 = vmatpush3.bf16.msra.mxu1 %v3156_v37 }
 0x863   :  { %2686 = vmatprep.subr.bf16.mxu1 %v2948_v22 }
 0x92c   :  { %v1132_v33 = vpop.f32.mrb[14].mxu0 }
 0x92d   :  { %v1136_v35 = vadd.f32 %v1132_v33, %v3226_v60  ;;  %v2504_v36 = vpop.f32.mrb[15].mxu0 }
 0x92f   :  { %2774 = vtanh.f32 %v1136_v35  ;;  %v2257_v43 = vmul.f32 -1.442695, %v1136_v35 }
 0x930   :  { %v1207_v38 = vpop.f32.mrb[14].mxu1 }
 0x931   :  { %v1211_v39 = vadd.f32 %v1207_v38, %v3240_v11  ;;  %v2515_v40 = vpop.f32.mrb[15].mxu1 }
 0x933   :  { %2776 = vtanh.f32 %v1211_v39  ;;  %v2258_v44 = vmul.f32 -1.442695, %v1211_v39 }
 0x934   :  { %2778 = vpow2.f32 %v2257_v43 }
 0x935   :  { %2780 = vpow2.f32 %v2258_v44 }
 0x939   :  { %v2775_v41 = vpop.eup %2774 }
 0x93a   :  { %1221 = vrot.lane.b32.xlu0 %v2775_v41, %s2949_s2 }
 0x93d   :  { %v2777_v42 = vpop.eup %2776 }
 0x93e   :  { %1245 = vrot.lane.b32.xlu1 %v2777_v42, %s2949_s2  ;;  %v2779_v45 = vpop.eup %2778 }
 0x93f   :  { %v1215_v46 = vadd.f32 1.0, %v2779_v45  ;;  %v2781_v60 = vpop.eup %2780 }
 0x940   :  { %v1239_v48 = vadd.f32 1.0, %v2781_v60 }
 0x941   :  { %2782 = vrcp.f32 %v1215_v46 }
 0x942   :  { %2784 = vrcp.f32 %v1239_v48 }
 0x94b   :  { %v2783_v49 = vpop.eup %2782 }
 0x94c   :  { %v2785_v51 = vpop.eup %2784  ;;  %v1219_v55 = vmul.f32 %v2783_v49, %v1019_v20 }
 0x94d   :  { %v1243_v61 = vmul.f32 %v2785_v51, %v1043_v25 }
 0x9ac   :  { %v1222_v11 = vpop.permute.xlu0 %1221 }
 0x9ad   :  { %v1224_v50 = vmul.f32 %v2783_v49, %v1222_v11 }
 0x9af   :  { %1226 = vrot.lane.b32.xlu0 %v1224_v50, %s2949_s2 }
 0x9b0   :  { %v1246_v52 = vpop.permute.xlu1 %1245 }
 0x9b1   :  { %v1248_v54 = vmul.f32 %v2785_v51, %v1246_v52 }
 0x9b3   :  { %1250 = vrot.lane.b32.xlu1 %v1248_v54, %s2949_s2 }
 0xa21   :  { %v1227_v57 = vpop.permute.xlu0 %1226 }
 0xa22   :  { %v1229_v58 = vadd.f32 %v1227_v57, %v1219_v55 }
 0xa24   :  { %2786 = vtanh.f32 %v1229_v58 }
 0xa25   :  { %v1251_v63 = vpop.permute.xlu1 %1250 }
 0xa26   :  { %v1253_v1 = vadd.f32 %v1251_v63, %v1243_v61 }
 0xa28   :  { %2788 = vtanh.f32 %v1253_v1 }
 0xa2e   :  { %v2787_v2 = vpop.eup %2786 }
 0xa2f   :  { %1232 = vrot.lane.b32.xlu0 %v2787_v2, %s2949_s2 }
 0xa32   :  { %v2789_v5 = vpop.eup %2788 }
 0xa33   :  { %1256 = vrot.lane.b32.xlu1 %v2789_v5, %s2949_s2 }
 0xaa1   :  { %v1233_v62 = vpop.permute.xlu0 %1232 }
 0xaa2   :  { %v1235_v7 = vmul.f32 %v2783_v49, %v1233_v62 }
 0xaa4   :  { %1261 = vrot.lane.b32.xlu0 %v1235_v7, %s2952_s6 }
 0xaa5   :  { %v1257_v9 = vpop.permute.xlu1 %1256 }
 0xaa6   :  { %v1259_v8 = vmul.f32 %v2785_v51, %v1257_v9 }
 0xaa8   :  { %1267 = vrot.lane.b32.xlu1 %v1259_v8, %s2952_s6 }
 0xb16   :  { %v1262_v10 = vpop.permute.xlu0 %1261 }
 0xb17   :  { %2259 = vst.msk [vmem:[%s3557_s12 + $0x18] sm:$0xff] %vm91_vm0, %v1262_v10  ;;  %2525 = vmatmul.mubr.msk.f32.vlgmr.msra.gmra.mrb[16].mxu0 %vm91_vm0, %v1262_v10 }
 0xb18   :  { %2682 = vmatpush3.bf16.msra.mxu0 %v3095_v19  ;;  %2546 = vmatprep.mubr.msk.f32.mxu0 %vm2950_vm1, %v2951_v47 }
 0xb19   :  { %2683 = vmatprep.subr.bf16.mxu0 %v2948_v22 }
 0xb1a   :  { %v1268_v13 = vpop.permute.xlu1 %1267 }
 0xb1b   :  { %2260 = vst.msk [vmem:[%s3558_s13 + $0x20] sm:$0xff] %vm91_vm0, %v1268_v13  ;;  %2536 = vmatmul.mubr.msk.f32.vlgmr.msra.gmra.mrb[16].mxu1 %vm91_vm0, %v1268_v13 }
 0xb1c   :  { %2685 = vmatpush3.bf16.msra.mxu0 %v3141_v34  ;;  %2688 = vmatpush3.bf16.msra.mxu1 %v3114_v26 }
 0xb1d   :  { %2689 = vmatprep.subr.bf16.mxu1 %v2948_v22  ;;  %2557 = vmatprep.mubr.msk.f32.mxu1 %vm2950_vm1, %v2951_v47 }
 0xb1e   :  { %2692 = vmatprep.subr.bf16.mxu0 %v2948_v22 }
 0xb20   :  { %2691 = vmatpush3.bf16.msra.mxu1 %v3156_v37 }
 0xb21   :  { %2698 = vmatprep.subr.bf16.mxu1 %v2948_v22 }
 0xbea   :  { %v1342_v15 = vpop.f32.mrb[16].mxu0 }
 0xbeb   :  { %v1346_v16 = vadd.f32 %v1342_v15, %v3236_v6  ;;  %v2526_v17 = vpop.f32.mrb[17].mxu0 }
 0xbed   :  { %2790 = vtanh.f32 %v1346_v16  ;;  %v2263_v53 = vmul.f32 -1.442695, %v1346_v16 }
 0xbee   :  { %v1417_v18 = vpop.f32.mrb[16].mxu1 }
 0xbef   :  { %v1421_v20 = vadd.f32 %v1417_v18, %v3230_v0  ;;  %v2537_v23 = vpop.f32.mrb[17].mxu1 }
 0xbf1   :  { %2792 = vtanh.f32 %v1421_v20  ;;  %v2264_v27 = vmul.f32 -1.442695, %v1421_v20 }
 0xbf2   :  { %2794 = vpow2.f32 %v2263_v53 }
 0xbf3   :  { %2796 = vpow2.f32 %v2264_v27 }
 0xbf7   :  { %v2791_v24 = vpop.eup %2790 }
 0xbf8   :  { %1431 = vrot.lane.b32.xlu0 %v2791_v24, %s2949_s2 }
 0xbfb   :  { %v2793_v25 = vpop.eup %2792 }
 0xbfc   :  { %1455 = vrot.lane.b32.xlu1 %v2793_v25, %s2949_s2  ;;  %v2795_v28 = vpop.eup %2794 }
 0xbfd   :  { %v1425_v21 = vadd.f32 1.0, %v2795_v28  ;;  %v2797_v6 = vpop.eup %2796 }
 0xbfe   :  { %v1449_v29 = vadd.f32 1.0, %v2797_v6 }
 0xbff   :  { %2798 = vrcp.f32 %v1425_v21 }
 0xc00   :  { %2800 = vrcp.f32 %v1449_v29 }
 0xc09   :  { %v2799_v30 = vpop.eup %2798 }
 0xc0a   :  { %v2801_v32 = vpop.eup %2800  ;;  %v1429_v36 = vmul.f32 %v2799_v30, %v1229_v58 }
 0xc0b   :  { %v1453_v40 = vmul.f32 %v2801_v32, %v1253_v1 }
 0xc6a   :  { %v1432_v0 = vpop.permute.xlu0 %1431 }
 0xc6b   :  { %v1434_v31 = vmul.f32 %v2799_v30, %v1432_v0 }
 0xc6d   :  { %1436 = vrot.lane.b32.xlu0 %v1434_v31, %s2949_s2 }
 0xc6e   :  { %v1456_v33 = vpop.permute.xlu1 %1455 }
 0xc6f   :  { %v1458_v35 = vmul.f32 %v2801_v32, %v1456_v33 }
 0xc71   :  { %1460 = vrot.lane.b32.xlu1 %v1458_v35, %s2949_s2 }
 0xcdf   :  { %v1437_v38 = vpop.permute.xlu0 %1436 }
 0xce0   :  { %v1439_v39 = vadd.f32 %v1437_v38, %v1429_v36 }
 0xce2   :  { %2802 = vtanh.f32 %v1439_v39 }
 0xce3   :  { %v1461_v41 = vpop.permute.xlu1 %1460 }
 0xce4   :  { %v1463_v42 = vadd.f32 %v1461_v41, %v1453_v40 }
 0xce6   :  { %2804 = vtanh.f32 %v1463_v42 }
 0xcec   :  { %v2803_v43 = vpop.eup %2802 }
 0xced   :  { %1442 = vrot.lane.b32.xlu0 %v2803_v43, %s2949_s2 }
 0xcf0   :  { %v2805_v44 = vpop.eup %2804 }
 0xcf1   :  { %1466 = vrot.lane.b32.xlu1 %v2805_v44, %s2949_s2 }
 0xd5f   :  { %v1443_v45 = vpop.permute.xlu0 %1442 }
 0xd60   :  { %v1445_v46 = vmul.f32 %v2799_v30, %v1443_v45 }
 0xd62   :  { %1471 = vrot.lane.b32.xlu0 %v1445_v46, %s2952_s6 }
 0xd63   :  { %v1467_v60 = vpop.permute.xlu1 %1466 }
 0xd64   :  { %v1469_v48 = vmul.f32 %v2801_v32, %v1467_v60 }
 0xd66   :  { %1477 = vrot.lane.b32.xlu1 %v1469_v48, %s2952_s6 }
 0xdd4   :  { %v1472_v49 = vpop.permute.xlu0 %1471 }
 0xdd5   :  { %2265 = vst.msk [vmem:[%s3557_s12 + $0x20] sm:$0xff] %vm91_vm0, %v1472_v49  ;;  %2547 = vmatmul.mubr.msk.f32.vlgmr.msra.gmra.mrb[18].mxu0 %vm91_vm0, %v1472_v49 }
 0xdd6   :  { %2694 = vmatpush3.bf16.msra.mxu0 %v3095_v19  ;;  %2568 = vmatprep.mubr.msk.f32.mxu0 %vm2950_vm1, %v2951_v47 }
 0xdd7   :  { %2695 = vmatprep.subr.bf16.mxu0 %v2948_v22 }
 0xdd8   :  { %v1478_v11 = vpop.permute.xlu1 %1477 }
 0xdd9   :  { %2266 = vst.msk [vmem:[%s3558_s13 + $0x18] sm:$0xff] %vm91_vm0, %v1478_v11  ;;  %2558 = vmatmul.mubr.msk.f32.vlgmr.msra.gmra.mrb[18].mxu1 %vm91_vm0, %v1478_v11 }
 0xdda   :  { %2697 = vmatpush3.bf16.msra.mxu0 %v3141_v34  ;;  %2700 = vmatpush3.bf16.msra.mxu1 %v3114_v26 }
 0xddb   :  { %2701 = vmatprep.subr.bf16.mxu1 %v2948_v22  ;;  %2579 = vmatprep.mubr.msk.f32.mxu1 %vm2950_vm1, %v2951_v47 }
 0xddc   :  { %2704 = vmatprep.subr.bf16.mxu0 %v2948_v22 }
 0xdde   :  { %2703 = vmatpush3.bf16.msra.mxu1 %v3156_v37 }
 0xddf   :  { %2710 = vmatprep.subr.bf16.mxu1 %v2948_v22 }
 0xea8   :  { %v1552_v50 = vpop.f32.mrb[18].mxu0 }
 0xea9   :  { %v1556_v51 = vadd.f32 %v1552_v50, %v3234_v4  ;;  %v2548_v52 = vpop.f32.mrb[19].mxu0 }
 0xeab   :  { %2806 = vtanh.f32 %v1556_v51  ;;  %v2269_v63 = vmul.f32 -1.442695, %v1556_v51 }
 0xeac   :  { %v1627_v54 = vpop.f32.mrb[18].mxu1 }
 0xead   :  { %v1631_v55 = vadd.f32 %v1627_v54, %v3232_v3  ;;  %v2559_v57 = vpop.f32.mrb[19].mxu1 }
 0xeaf   :  { %2808 = vtanh.f32 %v1631_v55  ;;  %v2270_v1 = vmul.f32 -1.442695, %v1631_v55 }
 0xeb0   :  { %2810 = vpow2.f32 %v2269_v63 }
 0xeb1   :  { %2812 = vpow2.f32 %v2270_v1 }
 0xeb5   :  { %v2807_v58 = vpop.eup %2806 }
 0xeb6   :  { %1641 = vrot.lane.b32.xlu0 %v2807_v58, %s2949_s2 }
 0xeb9   :  { %v2809_v61 = vpop.eup %2808 }
 0xeba   :  { %1665 = vrot.lane.b32.xlu1 %v2809_v61, %s2949_s2  ;;  %v2811_v2 = vpop.eup %2810 }
 0xebb   :  { %v1635_v5 = vadd.f32 1.0, %v2811_v2  ;;  %v2813_v4 = vpop.eup %2812 }
 0xebc   :  { %v1659_v62 = vadd.f32 1.0, %v2813_v4 }
 0xebd   :  { %2814 = vrcp.f32 %v1635_v5 }
 0xebe   :  { %2816 = vrcp.f32 %v1659_v62 }
 0xec7   :  { %v2815_v7 = vpop.eup %2814 }
 0xec8   :  { %v2817_v8 = vpop.eup %2816  ;;  %v1639_v15 = vmul.f32 %v2815_v7, %v1439_v39 }
 0xec9   :  { %v1663_v18 = vmul.f32 %v2817_v8, %v1463_v42 }
 0xf28   :  { %v1642_v3 = vpop.permute.xlu0 %1641 }
 0xf29   :  { %v1644_v9 = vmul.f32 %v2815_v7, %v1642_v3 }
 0xf2b   :  { %1646 = vrot.lane.b32.xlu0 %v1644_v9, %s2949_s2 }
 0xf2c   :  { %v1666_v10 = vpop.permute.xlu1 %1665 }
 0xf2d   :  { %v1668_v13 = vmul.f32 %v2817_v8, %v1666_v10 }
 0xf2f   :  { %1670 = vrot.lane.b32.xlu1 %v1668_v13, %s2949_s2 }
 0xf9d   :  { %v1647_v16 = vpop.permute.xlu0 %1646 }
 0xf9e   :  { %v1649_v17 = vadd.f32 %v1647_v16, %v1639_v15 }
 0xfa0   :  { %2818 = vtanh.f32 %v1649_v17 }
 0xfa1   :  { %v1671_v20 = vpop.permute.xlu1 %1670 }
 0xfa2   :  { %v1673_v23 = vadd.f32 %v1671_v20, %v1663_v18 }
 0xfa4   :  { %2820 = vtanh.f32 %v1673_v23 }
 0xfaa   :  { %v2819_v24 = vpop.eup %2818 }
 0xfab   :  { %1652 = vrot.lane.b32.xlu0 %v2819_v24, %s2949_s2 }
 0xfae   :  { %v2821_v25 = vpop.eup %2820 }
 0xfaf   :  { %1676 = vrot.lane.b32.xlu1 %v2821_v25, %s2949_s2 }
0x101d   :  { %v1653_v53 = vpop.permute.xlu0 %1652 }
0x101e   :  { %v1655_v27 = vmul.f32 %v2815_v7, %v1653_v53 }
0x1020   :  { %1681 = vrot.lane.b32.xlu0 %v1655_v27, %s2952_s6 }
0x1021   :  { %v1677_v28 = vpop.permute.xlu1 %1676 }
0x1022   :  { %v1679_v21 = vmul.f32 %v2817_v8, %v1677_v28 }
0x1024   :  { %1687 = vrot.lane.b32.xlu1 %v1679_v21, %s2952_s6 }
0x1092   :  { %v1682_v6 = vpop.permute.xlu0 %1681 }
0x1093   :  { %2271 = vst.msk [vmem:[%s3557_s12 + $0x28] sm:$0xff] %vm91_vm0, %v1682_v6  ;;  %2569 = vmatmul.mubr.msk.f32.vlgmr.msra.gmra.mrb[20].mxu0 %vm91_vm0, %v1682_v6 }
0x1094   :  { %2706 = vmatpush3.bf16.msra.mxu0 %v3095_v19  ;;  %2590 = vmatprep.mubr.msk.f32.mxu0 %vm2950_vm1, %v2951_v47 }
0x1095   :  { %2707 = vmatprep.subr.bf16.mxu0 %v2948_v22 }
0x1096   :  { %v1688_v29 = vpop.permute.xlu1 %1687 }
0x1097   :  { %2272 = vst.msk [vmem:[%s3558_s13 + $0x10] sm:$0xff] %vm91_vm0, %v1688_v29  ;;  %2580 = vmatmul.mubr.msk.f32.vlgmr.msra.gmra.mrb[20].mxu1 %vm91_vm0, %v1688_v29 }
0x1098   :  { %2709 = vmatpush3.bf16.msra.mxu0 %v3141_v34  ;;  %2712 = vmatpush3.bf16.msra.mxu1 %v3114_v26 }
0x1099   :  { %2713 = vmatprep.subr.bf16.mxu1 %v2948_v22  ;;  %2601 = vmatprep.mubr.msk.f32.mxu1 %vm2950_vm1, %v2951_v47 }
0x109c   :  { %2715 = vmatpush3.bf16.msra.mxu1 %v3156_v37 }
0x1166   :  { %v1762_v19 = vpop.f32.mrb[20].mxu0 }
0x1167   :  { %v1766_v30 = vadd.f32 %v1762_v19, %v3244_v14  ;;  %v2570_v0 = vpop.f32.mrb[21].mxu0 }
0x1169   :  { %2822 = vtanh.f32 %v1766_v30  ;;  %v2275_v22 = vmul.f32 -1.442695, %v1766_v30 }
0x116a   :  { %v1837_v31 = vpop.f32.mrb[20].mxu1 }
0x116b   :  { %v1841_v32 = vadd.f32 %v1837_v31, %v3222_v56  ;;  %v2581_v33 = vpop.f32.mrb[21].mxu1 }
0x116d   :  { %2824 = vtanh.f32 %v1841_v32  ;;  %v2276_v47 = vmul.f32 -1.442695, %v1841_v32 }
0x116e   :  { %2826 = vpow2.f32 %v2275_v22 }
0x116f   :  { %2828 = vpow2.f32 %v2276_v47 }
0x1173   :  { %v2823_v34 = vpop.eup %2822 }
0x1174   :  { %1851 = vrot.lane.b32.xlu0 %v2823_v34, %s2949_s2 }
0x1177   :  { %v2825_v26 = vpop.eup %2824 }
0x1178   :  { %1875 = vrot.lane.b32.xlu1 %v2825_v26, %s2949_s2  ;;  %v2827_v37 = vpop.eup %2826 }
0x1179   :  { %v1845_v35 = vadd.f32 1.0, %v2827_v37  ;;  %v2829_v14 = vpop.eup %2828 }
0x117a   :  { %v1869_v36 = vadd.f32 1.0, %v2829_v14 }
0x117b   :  { %2830 = vrcp.f32 %v1845_v35 }
0x117c   :  { %2832 = vrcp.f32 %v1869_v36 }
0x1185   :  { %v2831_v38 = vpop.eup %2830 }
0x1186   :  { %v2833_v40 = vpop.eup %2832  ;;  %v1849_v43 = vmul.f32 %v2831_v38, %v1649_v17 }
0x1187   :  { %v1873_v46 = vmul.f32 %v2833_v40, %v1673_v23 }
0x11e6   :  { %v1852_v56 = vpop.permute.xlu0 %1851 }
0x11e7   :  { %v1854_v39 = vmul.f32 %v2831_v38, %v1852_v56 }
0x11e9   :  { %1856 = vrot.lane.b32.xlu0 %v1854_v39, %s2949_s2 }
0x11ea   :  { %v1876_v41 = vpop.permute.xlu1 %1875 }
0x11eb   :  { %v1878_v42 = vmul.f32 %v2833_v40, %v1876_v41 }
0x11ed   :  { %1880 = vrot.lane.b32.xlu1 %v1878_v42, %s2949_s2 }
0x125b   :  { %v1857_v44 = vpop.permute.xlu0 %1856 }
0x125c   :  { %v1859_v45 = vadd.f32 %v1857_v44, %v1849_v43 }
0x125e   :  { %2834 = vtanh.f32 %v1859_v45 }
0x125f   :  { %v1881_v60 = vpop.permute.xlu1 %1880 }
0x1260   :  { %v1883_v48 = vadd.f32 %v1881_v60, %v1873_v46 }
0x1262   :  { %2836 = vtanh.f32 %v1883_v48 }
0x1268   :  { %v2835_v49 = vpop.eup %2834 }
0x1269   :  { %1862 = vrot.lane.b32.xlu0 %v2835_v49, %s2949_s2 }
0x126c   :  { %v2837_v11 = vpop.eup %2836 }
0x126d   :  { %1886 = vrot.lane.b32.xlu1 %v2837_v11, %s2949_s2 }
0x12db   :  { %v1863_v50 = vpop.permute.xlu0 %1862 }
0x12dc   :  { %v1865_v51 = vmul.f32 %v2831_v38, %v1863_v50 }
0x12de   :  { %1891 = vrot.lane.b32.xlu0 %v1865_v51, %s2952_s6 }
0x12df   :  { %v1887_v52 = vpop.permute.xlu1 %1886 }
0x12e0   :  { %v1889_v54 = vmul.f32 %v2833_v40, %v1887_v52 }
0x12e2   :  { %1897 = vrot.lane.b32.xlu1 %v1889_v54, %s2952_s6 }
0x1350   :  { %v1892_v55 = vpop.permute.xlu0 %1891 }
0x1351   :  { %2277 = vst.msk [vmem:[%s3557_s12 + $0x30] sm:$0xff] %vm91_vm0, %v1892_v55  ;;  %2591 = vmatmul.mubr.msk.f32.vlgmr.msra.gmra.mrb[22].mxu0 %vm91_vm0, %v1892_v55 }
0x1354   :  { %v1898_v57 = vpop.permute.xlu1 %1897 }
0x1355   :  { %2278 = vst.msk [vmem:[%s3558_s13 + $0x8] sm:$0xff] %vm91_vm0, %v1898_v57  ;;  %2602 = vmatmul.mubr.msk.f32.vlgmr.msra.gmra.mrb[22].mxu1 %vm91_vm0, %v1898_v57 }
0x1424   :  { %v1972_v58 = vpop.f32.mrb[22].mxu0 }
0x1425   :  { %v1976_v61 = vadd.f32 %v1972_v58, %v3242_v12  ;;  %v2592_v63 = vpop.f32.mrb[23].mxu0 }
0x1427   :  { %2838 = vtanh.f32 %v1976_v61  ;;  %v2281_v7 = vmul.f32 -1.442695, %v1976_v61 }
0x1428   :  { %v2046_v1 = vpop.f32.mrb[22].mxu1 }
0x1429   :  { %v2050_v2 = vadd.f32 %v2046_v1, %v3224_v59  ;;  %v2603_v5 = vpop.f32.mrb[23].mxu1 }
0x142b   :  { %2840 = vtanh.f32 %v2050_v2  ;;  %v2282_v3 = vmul.f32 -1.442695, %v2050_v2 }
0x142c   :  { %2842 = vpow2.f32 %v2281_v7 }
0x142d   :  { %2844 = vpow2.f32 %v2282_v3 }
0x1431   :  { %v2839_v4 = vpop.eup %2838 }
0x1432   :  { %2060 = vrot.lane.b32.xlu0 %v2839_v4, %s2949_s2 }
0x1435   :  { %v2841_v62 = vpop.eup %2840 }
0x1436   :  { %2084 = vrot.lane.b32.xlu1 %v2841_v62, %s2949_s2  ;;  %v2843_v9 = vpop.eup %2842 }
0x1437   :  { %v2054_v8 = vadd.f32 1.0, %v2843_v9  ;;  %v2845_v12 = vpop.eup %2844 }
0x1438   :  { %v2078_v10 = vadd.f32 1.0, %v2845_v12 }
0x1439   :  { %2846 = vrcp.f32 %v2054_v8 }
0x143a   :  { %2848 = vrcp.f32 %v2078_v10 }
0x1443   :  { %v2847_v13 = vpop.eup %2846 }
0x1444   :  { %v2849_v16 = vpop.eup %2848  ;;  %v2058_v20 = vmul.f32 %v2847_v13, %v1859_v45 }
0x1445   :  { %v2082_v25 = vmul.f32 %v2849_v16, %v1883_v48 }
0x14a4   :  { %v2061_v59 = vpop.permute.xlu0 %2060 }
0x14a5   :  { %v2063_v15 = vmul.f32 %v2847_v13, %v2061_v59 }
0x14a7   :  { %2065 = vrot.lane.b32.xlu0 %v2063_v15, %s2949_s2 }
0x14a8   :  { %v2085_v17 = vpop.permute.xlu1 %2084 }
0x14a9   :  { %v2087_v18 = vmul.f32 %v2849_v16, %v2085_v17 }
0x14ab   :  { %2089 = vrot.lane.b32.xlu1 %v2087_v18, %s2949_s2 }
0x1519   :  { %v2066_v23 = vpop.permute.xlu0 %2065 }
0x151a   :  { %v2068_v24 = vadd.f32 %v2066_v23, %v2058_v20 }
0x151c   :  { %2850 = vtanh.f32 %v2068_v24 }
0x151d   :  { %v2090_v53 = vpop.permute.xlu1 %2089 }
0x151e   :  { %v2092_v27 = vadd.f32 %v2090_v53, %v2082_v25 }
0x1520   :  { %2852 = vtanh.f32 %v2092_v27 }
0x1526   :  { %v2851_v28 = vpop.eup %2850 }
0x1527   :  { %2071 = vrot.lane.b32.xlu0 %v2851_v28, %s2949_s2 }
0x152a   :  { %v2853_v21 = vpop.eup %2852 }
0x152b   :  { %2095 = vrot.lane.b32.xlu1 %v2853_v21, %s2949_s2  ;;  %2112 = vrot.lane.b32.xlu0 %v2068_v24, %s2953_s18 }
0x1599   :  { %v2072_v6 = vpop.permute.xlu0 %2071 }
0x159a   :  { %v2074_v29 = vmul.f32 %v2847_v13, %v2072_v6 }
0x159c   :  { %2100 = vrot.lane.b32.xlu1 %v2074_v29, %s2952_s6 }
0x159d   :  { %v2096_v19 = vpop.permute.xlu1 %2095  ;;  %v2113_v30 = vpop.permute.xlu0 %2112 }
0x159e   :  { %v2098_v0 = vmul.f32 %v2849_v16, %v2096_v19  ;;  %2115 = vst.msk [vmem:[#allocation3] sm:$0xff] %vm91_vm0, %v2113_v30  ;;  %2126 = vst.msk [vmem:[#allocation10] sm:$0xff] %vm91_vm0, %v2113_v30 }
0x159f   :  { %2865 = shalt.err (!%p2862_p4)
}
0x15a0   :  { %s2866_s21 = scalar_lea.hbm %s3560_s15, 128 }
0x15a1   :  { %p2867_p5 = scmp.ne.s32.totalorder %s3560_s15, %s2866_s21  ;;  %p2870_p6 = scmp.lt.u32.totalorder %s2866_s21, %s3560_s15 }
0x15a3   :  { %p2872_p7 = pnand %p2870_p6, %p2867_p5 }
0x15a5   :  { %2875 = shalt.err (!%p2872_p7)
}
0x15a6   :  { %2160 = dma.vmem_to_hbm [thread:$0]  %s2158_s3, 128, %s3560_s15, [#allocation11]   ;;  %2106 = vrot.lane.b32.xlu0 %v2098_v0, %s2952_s6  ;;  %2118 = vrot.lane.b32.xlu1 %v2092_v27, %s2953_s18 }
0x15a7   :  { %s2955_s28 = smov [#allocation8]   ;;  %s2956_s23 = smov [#allocation12]  }
0x15a8   :  { %s2147_s0 = sshll.u32 %s2955_s28, 4  ;;  %s2167_s29 = sshll.u32 %s2956_s23, 4  ;;  %s2148_s0 = int_to_ptr.vmem [resolvable:$true] %s2147_s0  ;;  %s2168_s29 = int_to_ptr.vmem [resolvable:$true] %s2167_s29 }
0x15a9   :  { %s2957_s7 = smov [#allocation13]   ;;  %s2876_s9 = scalar_lea.vmem %s2148_s0, 128 }
0x15aa   :  { %s2177_s15 = sshll.u32 %s2957_s7, 4  ;;  %p2877_p8 = scmp.ne.s32.totalorder %s2148_s0, %s2876_s9  ;;  %s3506_s15 = int_to_ptr.vmem [resolvable:$true] %s2177_s15 }
0x15ab   :  { %p2881_p9 = scmp.lt.s32.totalorder %s2148_s0, %s2148_s0  ;;  %p2882_p10 = scmp.lt.s32.totalorder %s2876_s9, %s2876_s9 }
0x15ad   :  { %p2883_p11 = por %p2882_p10, %p2881_p9 }
0x15af   :  { %p2884_p12 = pnand %p2883_p11, %p2877_p8 }
0x160e   :  { %v2101_v31 = vpop.permute.xlu1 %2100 }
0x160f   :  { %2283 = vst.msk [vmem:[%s3557_s12 + $0x38] sm:$0xff] %vm91_vm0, %v2101_v31  ;;  %2110 = vst.msk [vmem:[#allocation2] sm:$0xff] %vm91_vm0, %v2101_v31 }
0x1610   :  { %2125 = vst.msk [vmem:[#allocation8] sm:$0xff] %vm91_vm0, %v2101_v31 }
0x1611   :  { %2887 = shalt.err (!%p2884_p12)
}
0x1612   :  { %s2888_s11 = scalar_lea.hbm %s3559_s14, 128 }
0x1613   :  { %p2889_p13 = scmp.ne.s32.totalorder %s3559_s14, %s2888_s11  ;;  %p2892_p0 = scmp.lt.u32.totalorder %s2888_s11, %s3559_s14 }
0x1615   :  { %p2894_p1 = pnand %p2892_p0, %p2889_p13 }
0x1617   :  { %2897 = shalt.err (!%p2894_p1)
}
0x1618   :  { %2150 = dma.vmem_to_hbm [thread:$0]  %s2148_s0, 128, %s3559_s14, [#allocation9]   ;;  %v2119_v32 = vpop.permute.xlu1 %2118  ;;  %v2107_v33 = vpop.permute.xlu0 %2106 }
0x1619   :  { %2121 = vst.msk [vmem:[#allocation5] sm:$0xff] %vm91_vm0, %v2119_v32  ;;  %2128 = vst.msk [vmem:[#allocation13] sm:$0xff] %vm91_vm0, %v2119_v32  ;;  %s2898_s21 = scalar_lea.vmem %s2168_s29, 128  ;;  %p2903_p3 = scmp.lt.s32.totalorder %s2168_s29, %s2168_s29 }
0x161a   :  { %2109 = vst.msk [vmem:[%s3558_s13] sm:$0xff] %vm91_vm0, %v2107_v33  ;;  %2116 = vst.msk [vmem:[#allocation4] sm:$0xff] %vm91_vm0, %v2107_v33  ;;  %p2899_p2 = scmp.ne.s32.totalorder %s2168_s29, %s2898_s21  ;;  %p2904_p4 = scmp.lt.s32.totalorder %s2898_s21, %s2898_s21 }
0x161b   :  { %2127 = vst.msk [vmem:[#allocation12] sm:$0xff] %vm91_vm0, %v2107_v33 }
0x161c   :  { %p2905_p5 = por %p2904_p4, %p2903_p3 }
0x161e   :  { %p2906_p6 = pnand %p2905_p5, %p2899_p2 }
0x1620   :  { %2909 = shalt.err (!%p2906_p6)
}
0x1621   :  { %s2910_s24 = scalar_lea.hbm %s3561_s16, 128 }
0x1622   :  { %p2911_p7 = scmp.ne.s32.totalorder %s3561_s16, %s2910_s24  ;;  %p2914_p8 = scmp.lt.u32.totalorder %s2910_s24, %s3561_s16 }
0x1624   :  { %p2916_p9 = pnand %p2914_p8, %p2911_p7 }
0x1626   :  { %2919 = shalt.err (!%p2916_p9)
}
0x1627   :  { %2170 = dma.vmem_to_hbm [thread:$0]  %s2168_s29, 128, %s3561_s16, [#allocation11]  }
0x1628   :  { %s2920_s0 = scalar_lea.vmem %s3506_s15, 128  ;;  %p2925_p11 = scmp.lt.s32.totalorder %s3506_s15, %s3506_s15 }
0x1629   :  { %p2921_p10 = scmp.ne.s32.totalorder %s3506_s15, %s2920_s0  ;;  %p2926_p12 = scmp.lt.s32.totalorder %s2920_s0, %s2920_s0 }
0x162b   :  { %p2927_p13 = por %p2926_p12, %p2925_p11 }
0x162d   :  { %p2928_p0 = pnand %p2927_p13, %p2921_p10 }
0x162f   :  { %2931 = shalt.err (!%p2928_p0)
}
0x1630   :  { %s2932_s8 = scalar_lea.hbm %s3562_s17, 128 }
0x1631   :  { %p2933_p1 = scmp.ne.s32.totalorder %s3562_s17, %s2932_s8  ;;  %p2936_p2 = scmp.lt.u32.totalorder %s2932_s8, %s3562_s17 }
0x1633   :  { %p2938_p3 = pnand %p2936_p2, %p2933_p1 }
0x1635   :  { %2941 = shalt.err (!%p2938_p3)
}
0x1636   :  { %2180 = dma.vmem_to_hbm [thread:$0]  %s3506_s15, 128, %s3562_s17, [#allocation14]  }
0x1637   :  { %2942 = dma.done.wait [#allocation9], 128  }
0x1638   :  { %2943 = vsyncadd [#allocation9], 4294967168 }
0x1639   :  { %2944 = dma.done.wait [#allocation11], 256  }
0x163a   :  { %2945 = vsyncadd [#allocation11], 4294967040 }
0x163b   :  { %2946 = dma.done.wait [#allocation14], 128  }
0x163c   :  { %2947 = vsyncadd [#allocation14], 4294967168 }
0x163d   :  { %2203 = vsyncpa [#allocation9], 1 }
0x163e   :  { %2204 = vsyncpa [#allocation11], 1 }
0x163f   :  { %2205 = vsyncpa [#allocation14], 1 }

</bundles_post_ra>
